<compile_context>
chip_gen: v7x
topology: tpu7x:2x2x1
jax: 0.10.0
libtpu: 0.0.40
codegen_flags: <defaults>
</compile_context>

<pallas_src>
import jax
import jax.numpy as jnp
from jax import lax
from jax.experimental import pallas as pl
from jax.experimental.pallas import tpu as pltpu

IN_F = 28 * 28      # 784
H1_F = 512
H2_F = 256


def discriminator_kernel(x_ref, w1_ref, b1_ref, w2_ref, b2_ref, w3_ref, b3_ref, o_ref):
    x = x_ref[...]                                       # (TM, 784) bf16, streamed

    # Layer 1: (TM, 784) @ (784, 512) + (1, 512) -> LeakyReLU(0.2)
    h1 = jnp.dot(x, w1_ref[...], preferred_element_type=jnp.float32) + b1_ref[...]
    h1 = jnp.maximum(h1, 0.2 * h1)

    # Layer 2: (TM, 512) @ (512, 256) + (1, 256) -> LeakyReLU(0.2)
    h2 = jnp.dot(h1.astype(jnp.bfloat16), w2_ref[...],
                 preferred_element_type=jnp.float32) + b2_ref[...]
    h2 = jnp.maximum(h2, 0.2 * h2)

    # Layer 3 (lane-packed): (1, 256) x (TM, 256)^T -> (1, TM), + scalar bias
    z = lax.dot_general(w3_ref[...], h2.astype(jnp.bfloat16),
                        dimension_numbers=(((1,), (1,)), ((), ())),
                        preferred_element_type=jnp.float32) + b3_ref[...]

    # Numerically stable sigmoid: exp(-|z|) never overflows.
    e = jnp.exp(-jnp.abs(z))                             # EUP
    r = pl.reciprocal(1.0 + e, approx=True)              # EUP vrcp, VALU stays free
    o_ref[...] = jnp.where(z >= 0, r, 1.0 - r)


def prepare_params(params):
    """One-time parameter prep (after init / each optimizer step, NOT per forward):
    bf16 weight cast; w3 stored as a (1, 256) row; b3 as a (1, 1) f32 scalar."""
    w1, b1, w2, b2, w3, b3 = params
    return (
        w1.astype(jnp.bfloat16), b1.reshape(1, -1).astype(jnp.float32),
        w2.astype(jnp.bfloat16), b2.reshape(1, -1).astype(jnp.float32),
        w3.reshape(1, -1).astype(jnp.bfloat16),          # (1, 256)
        b3.reshape(1, 1).astype(jnp.float32),            # (1, 1)
    )


def _choose_tm(B):
    if B <= 256:
        return B                                  # single block; block dims == array dims
    # >= 2 grid steps so v7x's two TensorCores both get work; 128-row aligned tiles
    # keep the (1, tm) output stores unmasked. Cap at 1024 for v5e's 16 MiB scoped VMEM.
    tm = ((pl.cdiv(B, 2) + 127) // 128) * 128
    return min(tm, 1024)


def discriminator_forward(x, prepared, *, tm=None):
    """x: (B, 784) float (image flattened). Returns (B, 1) sigmoid probabilities."""
    w1, b1, w2, b2, w3, b3 = prepared
    B = x.shape[0]

    # Stream activations in bf16 (halves the dominant x DMA traffic; the MXU wants
    # bf16 anyway). In a fused training step this cast belongs upstream.
    x = x.astype(jnp.bfloat16)

    if tm is None:
        tm = _choose_tm(B)
    grid = (pl.cdiv(B, tm),)

    flops = 2 * B * (IN_F * H1_F + H1_F * H2_F + H2_F * 1)
    bytes_accessed = (
        B * IN_F * 2
        + (w1.size + w2.size + w3.size) * 2
        + (b1.size + b2.size + b3.size) * 4
        + B * 4
    )

    out = pl.pallas_call(
        discriminator_kernel,
        out_shape=jax.ShapeDtypeStruct((1, B), jnp.float32),
        grid_spec=pltpu.PrefetchScalarGridSpec(
            num_scalar_prefetch=0,
            grid=grid,
            in_specs=[
                # activations stream (one TM-row tile per grid step)
                pl.BlockSpec((tm, IN_F), lambda i: (i, 0)),
                # weights/biases: constant index_map -> resident in VMEM, loaded once
                pl.BlockSpec((IN_F, H1_F), lambda i: (0, 0)),
                pl.BlockSpec((1, H1_F), lambda i: (0, 0)),
                pl.BlockSpec((H1_F, H2_F), lambda i: (0, 0)),
                pl.BlockSpec((1, H2_F), lambda i: (0, 0)),
                pl.BlockSpec((1, H2_F), lambda i: (0, 0)),
                pl.BlockSpec((1, 1), lambda i: (0, 0)),
            ],
            # lane-packed output: (1, tm) blocks of a (1, B) result
            out_specs=pl.BlockSpec((1, tm), lambda i: (0, i)),
        ),
        compiler_params=pltpu.CompilerParams(
            # batch axis is embarrassingly parallel -> v7x dual-TC sharding
            dimension_semantics=("parallel",),
            vmem_limit_bytes=32 * 1024 * 1024,
        ),
        cost_estimate=pl.CostEstimate(
            flops=int(flops),
            transcendentals=int(B),
            bytes_accessed=int(bytes_accessed),
        ),
    )(x, w1, b1, w2, b2, w3, b3)

    # (1, B) -> (B, 1): pure reshape, no gather.
    return out.reshape(B, 1)


def init_params(key):
    """Deterministic init mimicking PyTorch nn.Linear default (uniform +-1/sqrt(fan_in))."""
    ks = jax.random.split(key, 6)

    def lin(kw, kb, fan_in, fan_out):
        bound = 1.0 / jnp.sqrt(fan_in)
        w = jax.random.uniform(kw, (fan_in, fan_out), jnp.float32, -bound, bound)
        b = jax.random.uniform(kb, (fan_out,), jnp.float32, -bound, bound)
        return w, b

    w1, b1 = lin(ks[0], ks[1], IN_F, H1_F)
    w2, b2 = lin(ks[2], ks[3], H1_F, H2_F)
    w3, b3 = lin(ks[4], ks[5], H2_F, 1)
    return (w1, b1, w2, b2, w3, b3)


def reference_forward(x, params):
    """Pure-f32 reference (PyTorch forward semantics)."""
    w1, b1, w2, b2, w3, b3 = params
    h1 = x @ w1 + b1
    h1 = jnp.where(h1 > 0, h1, 0.2 * h1)
    h2 = h1 @ w2 + b2
    h2 = jnp.where(h2 > 0, h2, 0.2 * h2)
    return jax.nn.sigmoid(h2 @ w3 + b3)


if __name__ == "__main__":
    key = jax.random.PRNGKey(0)
    k_param, k_x = jax.random.split(key)

    params = init_params(k_param)
    prepared = prepare_params(params)      # bf16 cast + layer-3 row packing, done once

    B = 256
    # Flattened 28x28 "image" batch, as the PyTorch Discriminator expects.
    x = jax.random.normal(k_x, (B, IN_F), jnp.float32)

    # tm=128 -> grid of 2 batch tiles: exercises the pipelined / gridded path
    # (and the dual-TC parallel split on v7x) even at this small test batch.
    out = discriminator_forward(x, prepared, tm=128)
    out = jax.block_until_ready(out)

    ref = reference_forward(x, params)
    assert out.shape == (B, 1), f"bad shape {out.shape}"
    # bf16 activations+weights vs pure-f32 reference: allow ~3e-2 deviation.
    max_err = jnp.max(jnp.abs(out - ref))
    assert jnp.allclose(out, ref, atol=3e-2, rtol=0.0), (
        f"mismatch vs reference, max abs err = {max_err}"
    )
    assert jnp.all(jnp.isfinite(out)), "non-finite output"

    print("KERNEL_OK")
</pallas_src>

<mosaic_0001>
module attributes {stable_mosaic.version = 11 : i64} {
  func.func @discriminator_kernel(%arg0: i32, %arg1: memref<128x784xbf16, #tpu.memory_space<vmem>>, %arg2: memref<784x512xbf16, #tpu.memory_space<vmem>>, %arg3: memref<1x512xf32, #tpu.memory_space<vmem>>, %arg4: memref<512x256xbf16, #tpu.memory_space<vmem>>, %arg5: memref<1x256xf32, #tpu.memory_space<vmem>>, %arg6: memref<1x256xbf16, #tpu.memory_space<vmem>>, %arg7: memref<1x1xf32, #tpu.memory_space<vmem>>, %arg8: memref<1x128xf32, #tpu.memory_space<vmem>>) attributes {dimension_semantics = [#tpu.dimension_semantics<parallel>], iteration_bounds = array<i64: 2>, scalar_prefetch = 0 : i64, scratch_operands = 0 : i64, tpu.core_type = #tpu.core_type<tc>, window_params = [{transform_indices = @transform_0, window_bounds = array<i64: 128, 784>}, {pipeline_mode = #tpu.pipeline_mode<synchronous>, transform_indices = @transform_1, window_bounds = array<i64: 784, 512>}, {pipeline_mode = #tpu.pipeline_mode<synchronous>, transform_indices = @transform_2, window_bounds = array<i64: 1, 512>}, {pipeline_mode = #tpu.pipeline_mode<synchronous>, transform_indices = @transform_3, window_bounds = array<i64: 512, 256>}, {pipeline_mode = #tpu.pipeline_mode<synchronous>, transform_indices = @transform_4, window_bounds = array<i64: 1, 256>}, {pipeline_mode = #tpu.pipeline_mode<synchronous>, transform_indices = @transform_5, window_bounds = array<i64: 1, 256>}, {pipeline_mode = #tpu.pipeline_mode<synchronous>, transform_indices = @transform_6, window_bounds = array<i64: 1, 1>}, {transform_indices = @transform_7, window_bounds = array<i64: 1, 128>}]} {
    %c0 = arith.constant 0 : index
    %c0_0 = arith.constant 0 : index
    %0 = vector.load %arg1[%c0, %c0_0] : memref<128x784xbf16, #tpu.memory_space<vmem>>, vector<128x784xbf16>
    %c0_1 = arith.constant 0 : index
    %c0_2 = arith.constant 0 : index
    %1 = vector.load %arg2[%c0_1, %c0_2] : memref<784x512xbf16, #tpu.memory_space<vmem>>, vector<784x512xbf16>
    %cst = arith.constant dense<0.000000e+00> : vector<128x512xf32>
    %2 = tpu.matmul %0, %1, %cst {dimension_numbers = #tpu.dot_dimension_numbers<[1], [0], [0], [1], [0, 0, 1, 1], [], []>} : vector<128x784xbf16>, vector<784x512xbf16>, vector<128x512xf32> -> vector<128x512xf32>
    %c0_3 = arith.constant 0 : index
    %c0_4 = arith.constant 0 : index
    %3 = vector.load %arg3[%c0_3, %c0_4] : memref<1x512xf32, #tpu.memory_space<vmem>>, vector<1x512xf32>
    %4 = vector.broadcast %3 : vector<1x512xf32> to vector<128x512xf32>
    %5 = arith.addf %2, %4 : vector<128x512xf32>
    %cst_5 = arith.constant 2.000000e-01 : f32
    %6 = vector.broadcast %cst_5 : f32 to vector<128x512xf32>
    %7 = arith.mulf %6, %5 : vector<128x512xf32>
    %8 = arith.maximumf %5, %7 : vector<128x512xf32>
    %9 = arith.truncf %8 : vector<128x512xf32> to vector<128x512xbf16>
    %c0_6 = arith.constant 0 : index
    %c0_7 = arith.constant 0 : index
    %10 = vector.load %arg4[%c0_6, %c0_7] : memref<512x256xbf16, #tpu.memory_space<vmem>>, vector<512x256xbf16>
    %cst_8 = arith.constant dense<0.000000e+00> : vector<128x256xf32>
    %11 = tpu.matmul %9, %10, %cst_8 {dimension_numbers = #tpu.dot_dimension_numbers<[1], [0], [0], [1], [0, 0, 1, 1], [], []>} : vector<128x512xbf16>, vector<512x256xbf16>, vector<128x256xf32> -> vector<128x256xf32>
    %c0_9 = arith.constant 0 : index
    %c0_10 = arith.constant 0 : index
    %12 = vector.load %arg5[%c0_9, %c0_10] : memref<1x256xf32, #tpu.memory_space<vmem>>, vector<1x256xf32>
    %13 = vector.broadcast %12 : vector<1x256xf32> to vector<128x256xf32>
    %14 = arith.addf %11, %13 : vector<128x256xf32>
    %cst_11 = arith.constant 2.000000e-01 : f32
    %15 = vector.broadcast %cst_11 : f32 to vector<128x256xf32>
    %16 = arith.mulf %15, %14 : vector<128x256xf32>
    %17 = arith.maximumf %14, %16 : vector<128x256xf32>
    %c0_12 = arith.constant 0 : index
    %c0_13 = arith.constant 0 : index
    %18 = vector.load %arg6[%c0_12, %c0_13] : memref<1x256xbf16, #tpu.memory_space<vmem>>, vector<1x256xbf16>
    %19 = arith.truncf %17 : vector<128x256xf32> to vector<128x256xbf16>
    %cst_14 = arith.constant dense<0.000000e+00> : vector<1x128xf32>
    %20 = tpu.matmul %18, %19, %cst_14 {dimension_numbers = #tpu.dot_dimension_numbers<[1], [1], [0], [0], [0, 0, 1, 0], [], []>} : vector<1x256xbf16>, vector<128x256xbf16>, vector<1x128xf32> -> vector<1x128xf32>
    %c0_15 = arith.constant 0 : index
    %c0_16 = arith.constant 0 : index
    %21 = vector.load %arg7[%c0_15, %c0_16] : memref<1x1xf32, #tpu.memory_space<vmem>>, vector<1x1xf32>
    %22 = vector.broadcast %21 : vector<1x1xf32> to vector<1x128xf32>
    %23 = arith.addf %20, %22 : vector<1x128xf32>
    %24 = math.absf %23 : vector<1x128xf32>
    %cst_17 = arith.constant 0.000000e+00 : f32
    %25 = vector.broadcast %cst_17 : f32 to vector<1x128xf32>
    %26 = arith.subf %25, %24 : vector<1x128xf32>
    %27 = math.exp %26 : vector<1x128xf32>
    %cst_18 = arith.constant 1.000000e+00 : f32
    %28 = vector.broadcast %cst_18 : f32 to vector<1x128xf32>
    %29 = arith.addf %28, %27 : vector<1x128xf32>
    %30 = tpu.reciprocal %29 {approx = true} : vector<1x128xf32> -> vector<1x128xf32>
    %cst_19 = arith.constant 0.000000e+00 : f32
    %31 = vector.broadcast %cst_19 : f32 to vector<1x128xf32>
    %32 = arith.cmpf oge, %23, %31 : vector<1x128xf32>
    %cst_20 = arith.constant 1.000000e+00 : f32
    %33 = vector.broadcast %cst_20 : f32 to vector<1x128xf32>
    %34 = arith.subf %33, %30 : vector<1x128xf32>
    %35 = arith.select %32, %30, %34 : vector<1x128xi1>, vector<1x128xf32>
    %c0_21 = arith.constant 0 : index
    %c0_22 = arith.constant 0 : index
    %36 = vector.load %arg8[%c0_21, %c0_22] : memref<1x128xf32, #tpu.memory_space<vmem>>, vector<1x128xf32>
    tpu.vector_store %arg8[%c0_21, %c0_22], %35 {strides = array<i32>} : memref<1x128xf32, #tpu.memory_space<vmem>>, vector<1x128xf32>,
    return
  }
  func.func @transform_0(%arg0: i32) -> (i32, i32) {
    %c0_i32 = arith.constant 0 : i32
    %c0_i32_0 = arith.constant 0 : i32
    return %arg0, %c0_i32 : i32, i32
  }
  func.func @transform_1(%arg0: i32) -> (i32, i32) {
    %c0_i32 = arith.constant 0 : i32
    %c0_i32_0 = arith.constant 0 : i32
    %c0_i32_1 = arith.constant 0 : i32
    return %c0_i32, %c0_i32_0 : i32, i32
  }
  func.func @transform_2(%arg0: i32) -> (i32, i32) {
    %c0_i32 = arith.constant 0 : i32
    %c0_i32_0 = arith.constant 0 : i32
    %c0_i32_1 = arith.constant 0 : i32
    return %c0_i32, %c0_i32_0 : i32, i32
  }
  func.func @transform_3(%arg0: i32) -> (i32, i32) {
    %c0_i32 = arith.constant 0 : i32
    %c0_i32_0 = arith.constant 0 : i32
    %c0_i32_1 = arith.constant 0 : i32
    return %c0_i32, %c0_i32_0 : i32, i32
  }
  func.func @transform_4(%arg0: i32) -> (i32, i32) {
    %c0_i32 = arith.constant 0 : i32
    %c0_i32_0 = arith.constant 0 : i32
    %c0_i32_1 = arith.constant 0 : i32
    return %c0_i32, %c0_i32_0 : i32, i32
  }
  func.func @transform_5(%arg0: i32) -> (i32, i32) {
    %c0_i32 = arith.constant 0 : i32
    %c0_i32_0 = arith.constant 0 : i32
    %c0_i32_1 = arith.constant 0 : i32
    return %c0_i32, %c0_i32_0 : i32, i32
  }
  func.func @transform_6(%arg0: i32) -> (i32, i32) {
    %c0_i32 = arith.constant 0 : i32
    %c0_i32_0 = arith.constant 0 : i32
    %c0_i32_1 = arith.constant 0 : i32
    return %c0_i32, %c0_i32_0 : i32, i32
  }
  func.func @transform_7(%arg0: i32) -> (i32, i32) {
    %c0_i32 = arith.constant 0 : i32
    %c0_i32_0 = arith.constant 0 : i32
    return %c0_i32, %arg0 : i32, i32
  }
}

</mosaic_0001>

<bundles_post_ra>
// kernel: tpu_custom_call.1
= control target key start
LH: loop header
LB: loop body
LE: loop exit
PB: predicated region body
PF: predicated region fallthrough
CT: control target
= control target key end

     0   :  { %s6217_s0 = inlined_call_operand.vmem [shape: bf16[256,784], index: 0, kind: input, shape index: {}]   ;;  %s6218_s1 = inlined_call_operand.vmem [shape: bf16[784,512], index: 1, kind: input, shape index: {}]   ;;  %s6219_s2 = inlined_call_operand.vmem [shape: f32[1,512], index: 2, kind: input, shape index: {}]   ;;  %s6220_s3 = inlined_call_operand.hbm [shape: bf16[512,256], index: 3, kind: input, shape index: {}]   ;;  %s6221_s4 = inlined_call_operand.vmem [shape: f32[1,256], index: 4, kind: input, shape index: {}]   ;;  %s6222_s5 = inlined_call_operand.vmem [shape: bf16[1,256], index: 5, kind: input, shape index: {}]   ;;  %s6223_s6 = inlined_call_operand.<no memory space> [shape: f32[1,1], index: 6, kind: input, shape index: {}]   ;;  %s6224_s7 = inlined_call_operand.hbm [shape: f32[1,256], index: 7, kind: output, shape index: {}]  }
   0x1   :  { %v12_v0 = vstv %s6223_s6 }
   0x2   :  { %13 = vst [vmem:[#allocation2] sm:$0x1] %v12_v0 }
   0x3   :  { %14 = vsyncpa [#allocation4], 0 }
   0x4   :  { %15 = vsyncpa [#allocation5], 0 }
   0x5   :  { %17 = vsyncpa [#allocation5 + $0x1], 0  ;;  %s5145_s26 = smov 0   ;;  %s5147_s27 = smov 0  }
   0x6   :  { %s5149_s28 = smov 0   ;;  %s5151_s29 = smov 0  }
   0x7 LB: > { %s5166_s6 = sadd.s32 4294967295, %s5094_s29   ;;  %s3798_s30 = sadd.s32 4294967294, %s5094_s29   ;;  %s5094_s29 = sphi %s5151_s29, %s6240_s29   ;;  %s5090_s28 = sphi %s5149_s28, %s6239_s28   ;;  %s5086_s27 = sphi %s5147_s27, %s6238_s27   ;;  %s5082_s26 = sphi %s5145_s26, %s6237_s26  }
   0x8   : > { %s5170_s8 = sadd.s32 1, %s5094_s29   ;;  %s182_s9 = sadd.s32 1, %s5090_s28 }
   0x9   : > { %s179_s10 = ssub.s32 %s5094_s29, %s5170_s8  ;;  %p192_p0 = scmp.ne.s32.totalorder %s5090_s28, %s5086_s27 }
   0xa   : > { %p180_p1 = scmp.eq.s32.totalorder %s179_s10, 0  ;;  %p193_p2 = scmp.eq.s32.totalorder %s5166_s6, 1 }
   0xb   : > { %p198_p3 = scmp.ne.s32.totalorder %s5086_s27, %s5082_s26  ;;  %p199_p4 = scmp.eq.s32.totalorder %s3798_s30, 1 }
   0xc   : > { %s5181_s11 = scalar_select %p180_p1, %s5090_s28, %s182_s9  }
   0xd   : > { %p5183_p5 = por %p193_p2, %p192_p0  ;;  %p5187_p6 = por %p199_p4, %p198_p3 }
   0xe   : > { %p3799_p7 = scmp.ge.s32.totalorder %s5094_s29, 1  ;;  %p206_p8 = scmp.lt.s32.totalorder %s5094_s29, 3 }
   0xf   : > { %s6228_s12 = scalar_select %p5183_p5, 1, 0 }
  0x10   : > { %s6229_s13 = scalar_select %p5187_p6, 1, 0 }
  0x11   : > { %p6225_p9 = scmp.eq.s32.totalorder %s5166_s6, 0  ;;  %p5194_p10 = pnand %p3799_p7, %p206_p8 }
  0x12   : > { %s5096_s15 = smov [#allocation3]   ;;  %s5000_s20 = scalar_lea.hbm %s6220_s3, 8192 }
  0x13   : > { %s6230_s14 = scalar_select %p5194_p10, 1, 0 }
  0x14   : > { %s224_s16 = sshll.u32 %s5096_s15, 4  ;;  %p4469_p11 = pneg %p5194_p10  ;;  %s225_s16 = int_to_ptr.vmem [resolvable:$true] %s224_s16 }
  0x15   : > { %p5001_p13 = scmp.ne.s32.totalorder %s6220_s3, %s5000_s20  ;;  %p5007_p3 = scmp.lt.u32.totalorder %s5000_s20, %s6220_s3 }
  0x16   : > { %p5202_p12 = pnand %p6225_p9, %p4469_p11 }
  0x18   : > { %p5002_p0 = pneg %p5202_p12 }
  0x1a   : > { %p5003_p1 = pnand %p5002_p0, %p5001_p13 }
  0x1c   : > { %p5004_p2 = pneg %p5003_p1 }
  0x1e   : > { %p5009_p4 = pnand %p5007_p3, %p5004_p2 }
  0x20   : > { %5012 = shalt.err (!%p5009_p4)
}
  0x21   : > { %s5013_s25 = scalar_lea.vmem %s225_s16, 8192  ;;  %p5021_p9 = scmp.lt.s32.totalorder %s225_s16, %s225_s16 }
  0x22   : > { %p5014_p7 = scmp.ne.s32.totalorder %s225_s16, %s5013_s25  ;;  %p5022_p6 = scmp.lt.s32.totalorder %s5013_s25, %s5013_s25 }
  0x24   : > { %p5016_p8 = pnand %p5014_p7, %p5002_p0  ;;  %p5023_p5 = por %p5022_p6, %p5021_p9 }
  0x26   : > { %p5017_p11 = pneg %p5016_p8 }
  0x28   : > { %p5024_p10 = pnand %p5023_p5, %p5017_p11 }
  0x2a   : > { %5027 = shalt.err (!%p5024_p10)
}
  0x2b   : > { %s5097_s30 = smov 128   ;;  %s5098_s9 = smov 8  }
  0x2c   : > { %4472 = dma.hbm_to_vmem [thread:$0]  (!%p5202_p12), %s6220_s3, 8192, %s225_s16, [#allocation4], %s5097_s30, %s5097_s30, %s5098_s9  }
  0x2d   : > { %p6232_p13 = scmp.ne.s32.totalorder %s6230_s14, 0 }
  0x2e   : > { %p6233_p1 = scmp.eq.s32.totalorder (!%p6232_p13), %s5166_s6, 0 }
  0x2f   : > { %259 = sbr.rel (%p6232_p13) target bundleno = 1092 (0x444), region = 48 }
  0x36   : > { %5073 = dma.done.wait (%p6233_p1), [#allocation4], 8192   ;;  %p6234_p0 = pmov %p6233_p1 }
  0x37   : > { %s5229_s18 = sshll.u32 %s5166_s6, 4  ;;  %v5099_v1 = vmov 0   ;;  %v4518_v2 = vld [vmem:[%s6218_s1 + $0x4] ss:$16 sps:$4 sm:$0xff]   ;;  %v4522_v4 = vld [vmem:[%s6218_s1] ss:$16 sps:$4 sm:$0xff]  }
  0x38   : > { %5075 = vsyncadd (%p6234_p0), [#allocation4], 4294959104  ;;  %2237 = vmatprep.mubr.bf16.mxu1 %v5099_v1  ;;  %p292_p5 = scmp.lt.s32.totalorder %s5229_s18, 31  ;;  %4517 = vset.pattern.permute.xlu0 %v5099_v1  ;;  %v4520_v3 = vld [vmem:[%s6218_s1 + $0x604] ss:$16 sps:$4 sm:$0xff]   ;;  %vm1841_vm0 = vcmask 130048  }
  0x39   : > { %1866 = vmatprep.subr.bf16.mxu0 %v4518_v2  ;;  %v4523_v5 = vld [vmem:[%s6218_s1 + $0x600] ss:$16 sps:$4 sm:$0xff]   ;;  %2205 = vmatprep.subr.bf16.mxu1 %v4520_v3  ;;  %v4524_v6 = vld [vmem:[%s6218_s1 + $0x24] ss:$16 sps:$4 sm:$0xff]   ;;  %v4527_v8 = vld [vmem:[%s6218_s1 + $0x8] ss:$16 sps:$4 sm:$0xff]  }
  0x3a   : > { %s293_s16 = scalar_select %p292_p5, %s5229_s18, 31  ;;  %1867 = vmatpush1.bf16.msra.mxu0 %v4522_v4  ;;  %2206 = vmatpush1.bf16.msra.mxu1 %v4523_v5  ;;  %v4529_v9 = vld [vmem:[%s6218_s1 + $0xc] ss:$16 sps:$4 sm:$0xff]   ;;  %v4530_v10 = vld [vmem:[%s6218_s1 + $0x20] ss:$16 sps:$4 sm:$0xff]  }
  0x3b   : > { %1868 = vmatprep.subr.bf16.mxu0 %v4524_v6  ;;  %2318 = vmatprep.subr.bf16.mxu1 %v4529_v9  ;;  %v4531_v11 = vld [vmem:[%s6218_s1 + $0x44] ss:$16 sps:$4 sm:$0xff]   ;;  %v4533_v12 = vld [vmem:[%s6218_s1 + $0x28] ss:$16 sps:$4 sm:$0xff]   ;;  %v4535_v13 = vld [vmem:[%s6218_s1 + $0x2c] ss:$16 sps:$4 sm:$0xff]  }
  0x3c   : > { %s4462_s14 = smul.u32 28, %s293_s16  ;;  %v4536_v14 = vld [vmem:[%s6218_s1 + $0x40] ss:$16 sps:$4 sm:$0xff]   ;;  %v4537_v15 = vld [vmem:[%s6218_s1 + $0x64] ss:$16 sps:$4 sm:$0xff]   ;;  %s289_s25 = sand.u32 1, %s5086_s27  }
  0x3d   : > { %v4540_v17 = vld [vmem:[%s6218_s1 + $0x48] ss:$16 sps:$4 sm:$0xff]   ;;  %v4542_v18 = vld [vmem:[%s6218_s1 + $0x4c] ss:$16 sps:$4 sm:$0xff]   ;;  %v4543_v19 = vld [vmem:[%s6218_s1 + $0x60] ss:$16 sps:$4 sm:$0xff]   ;;  %s6175_s16 = scalar_lea.hbm %s6224_s7, %s5229_s18 }
  0x3e   : > { %s5244_s23 = scalar_lea.vmem %s6217_s0, %s4462_s14  ;;  %1869 = vmatpush1.bf16.msra.mxu0 %v4530_v10  ;;  %v4544_v20 = vld [vmem:[%s6218_s1 + $0x84] ss:$16 sps:$4 sm:$0xff]   ;;  %v4548_v21 = vld [vmem:[%s6218_s1 + $0x6c] ss:$16 sps:$4 sm:$0xff]   ;;  %v4546_v22 = vld [vmem:[%s6218_s1 + $0x68] ss:$16 sps:$4 sm:$0xff]  }
  0x3f   : > { %v4526_v7 = vld [vmem:[%s5244_s23 + $0x18] ss:$28 sps:$4 sm:$0xff]   ;;  %1870 = vmatprep.subr.bf16.mxu0 %v4531_v11  ;;  %v4539_v16 = vld [vmem:[%s5244_s23 + $0x50] ss:$28 sps:$4 sm:$0xff]   ;;  %v4552_v25 = vld [vmem:[%s5244_s23 + $0x88] ss:$28 sps:$4 sm:$0xff]  }
  0x40   : > { %4058 = vmatmul.mubr.msk.bf16.vlgmr.msra.gmra.mrb[0].mxu1 %vm1841_vm0, %v4526_v7  ;;  %v4549_v23 = vld [vmem:[%s6218_s1 + $0x80] ss:$16 sps:$4 sm:$0xff]   ;;  %v4550_v24 = vld [vmem:[%s6218_s1 + $0xa4] ss:$16 sps:$4 sm:$0xff]   ;;  %v4555_v26 = vld [vmem:[%s6218_s1 + $0x8c] ss:$16 sps:$4 sm:$0xff]  }
  0x41   : > { %2319 = vmatpush1.bf16.msra.mxu1 %v4527_v8  ;;  %2247 = vmatprep.mubr.bf16.mxu1 %v5099_v1  ;;  %v4553_v27 = vld [vmem:[%s6218_s1 + $0x88] ss:$16 sps:$4 sm:$0xff]   ;;  %v4556_v28 = vld [vmem:[%s6218_s1 + $0xa0] ss:$16 sps:$4 sm:$0xff]   ;;  %v4557_v29 = vld [vmem:[%s6218_s1 + $0xc4] ss:$16 sps:$4 sm:$0xff]  }
  0x42   : > { %2320 = vmatprep.subr.bf16.mxu1 %v4535_v13  ;;  %1871 = vmatpush1.bf16.msra.mxu0 %v4536_v14  ;;  %v4561_v30 = vld [vmem:[%s6218_s1 + $0xac] ss:$16 sps:$4 sm:$0xff]   ;;  %v4559_v31 = vld [vmem:[%s6218_s1 + $0xa8] ss:$16 sps:$4 sm:$0xff]   ;;  %v4562_v32 = vld [vmem:[%s6218_s1 + $0xc0] ss:$16 sps:$4 sm:$0xff]  }
  0x43   : > { %1872 = vmatprep.subr.bf16.mxu0 %v4537_v15  ;;  %v4563_v33 = vld [vmem:[%s6218_s1 + $0xe4] ss:$16 sps:$4 sm:$0xff]   ;;  %v4568_v34 = vld [vmem:[%s6218_s1 + $0xcc] ss:$16 sps:$4 sm:$0xff]   ;;  %v4566_v36 = vld [vmem:[%s6218_s1 + $0xc8] ss:$16 sps:$4 sm:$0xff]  }
  0x44   : > { %v4565_v35 = vld [vmem:[%s5244_s23 + $0xc0] ss:$28 sps:$4 sm:$0xff]   ;;  %v4570_v38 = vld [vmem:[%s6218_s1 + $0x104] ss:$16 sps:$4 sm:$0xff]   ;;  %v4572_v40 = vld [vmem:[%s6218_s1 + $0xe8] ss:$16 sps:$4 sm:$0xff]  }
  0x45   : > { %2321 = vmatpush1.bf16.msra.mxu1 %v4533_v12  ;;  %v4569_v37 = vld [vmem:[%s6218_s1 + $0xe0] ss:$16 sps:$4 sm:$0xff]   ;;  %v4574_v39 = vld [vmem:[%s6218_s1 + $0xec] ss:$16 sps:$4 sm:$0xff]   ;;  %v4576_v42 = vld [vmem:[%s6218_s1 + $0x124] ss:$16 sps:$4 sm:$0xff]  }
  0x46   : > { %2322 = vmatprep.subr.bf16.mxu1 %v4542_v18  ;;  %1873 = vmatpush1.bf16.msra.mxu0 %v4543_v19  ;;  %v4575_v41 = vld [vmem:[%s6218_s1 + $0x100] ss:$16 sps:$4 sm:$0xff]   ;;  %v4581_v43 = vld [vmem:[%s6218_s1 + $0x10c] ss:$16 sps:$4 sm:$0xff]   ;;  %v4578_v44 = vld [vmem:[%s5244_s23 + $0xf8] ss:$28 sps:$4 sm:$0xff]  }
  0x47   : > { %1874 = vmatprep.subr.bf16.mxu0 %v4544_v20  ;;  %v4579_v45 = vld [vmem:[%s6218_s1 + $0x108] ss:$16 sps:$4 sm:$0xff]   ;;  %v4582_v46 = vld [vmem:[%s6218_s1 + $0x120] ss:$16 sps:$4 sm:$0xff]   ;;  %v4583_v47 = vld [vmem:[%s6218_s1 + $0x144] ss:$16 sps:$4 sm:$0xff]  }
  0x48   : > { %4059 = vmatmul.mubr.msk.bf16.gmra.mrb[4].mxu1 %vm1841_vm0, %v4539_v16  ;;  %v4587_v48 = vld [vmem:[%s6218_s1 + $0x12c] ss:$16 sps:$4 sm:$0xff]   ;;  %v4585_v49 = vld [vmem:[%s6218_s1 + $0x128] ss:$16 sps:$4 sm:$0xff]   ;;  %v4588_v50 = vld [vmem:[%s6218_s1 + $0x140] ss:$16 sps:$4 sm:$0xff]  }
  0x49   : > { %2323 = vmatpush1.bf16.msra.mxu1 %v4540_v17  ;;  %2257 = vmatprep.mubr.bf16.mxu1 %v5099_v1  ;;  %v4589_v51 = vld [vmem:[%s6218_s1 + $0x164] ss:$16 sps:$4 sm:$0xff]   ;;  %v4594_v52 = vld [vmem:[%s6218_s1 + $0x14c] ss:$16 sps:$4 sm:$0xff]   ;;  %v4592_v54 = vld [vmem:[%s6218_s1 + $0x148] ss:$16 sps:$4 sm:$0xff]  }
  0x4a   : > { %2324 = vmatprep.subr.bf16.mxu1 %v4548_v21  ;;  %1875 = vmatpush1.bf16.msra.mxu0 %v4549_v23  ;;  %v4591_v53 = vld [vmem:[%s5244_s23 + $0x130] ss:$28 sps:$4 sm:$0xff]   ;;  %v4596_v56 = vld [vmem:[%s6218_s1 + $0x184] ss:$16 sps:$4 sm:$0xff]   ;;  %v4598_v58 = vld [vmem:[%s6218_s1 + $0x168] ss:$16 sps:$4 sm:$0xff]  }
  0x4b   : > { %1876 = vmatprep.subr.bf16.mxu0 %v4550_v24  ;;  %v4595_v55 = vld [vmem:[%s6218_s1 + $0x160] ss:$16 sps:$4 sm:$0xff]   ;;  %v4600_v57 = vld [vmem:[%s6218_s1 + $0x16c] ss:$16 sps:$4 sm:$0xff]   ;;  %v4602_v60 = vld [vmem:[%s6218_s1 + $0x1a4] ss:$16 sps:$4 sm:$0xff]  }
  0x4c   : > { %v4601_v59 = vld [vmem:[%s6218_s1 + $0x180] ss:$16 sps:$4 sm:$0xff]   ;;  %v4607_v61 = vld [vmem:[%s6218_s1 + $0x18c] ss:$16 sps:$4 sm:$0xff]   ;;  %v4604_v62 = vld [vmem:[%s5244_s23 + $0x168] ss:$28 sps:$4 sm:$0xff]  }
  0x4d   : > { %2325 = vmatpush1.bf16.msra.mxu1 %v4546_v22  ;;  %v4605_v63 = vld [vmem:[%s6218_s1 + $0x188] ss:$16 sps:$4 sm:$0xff]   ;;  %v4608_v0 = vld [vmem:[%s6218_s1 + $0x1a0] ss:$16 sps:$4 sm:$0xff]   ;;  %v4609_v3 = vld [vmem:[%s6218_s1 + $0x1c4] ss:$16 sps:$4 sm:$0xff]  }
  0x4e   : > { %2326 = vmatprep.subr.bf16.mxu1 %v4555_v26  ;;  %1877 = vmatpush1.bf16.msra.mxu0 %v4556_v28  ;;  %v4624_v2 = vld [vmem:[%s5244_s23 + $0x4] ss:$28 sps:$4 sm:$0xff]   ;;  %v4613_v4 = vld [vmem:[%s6218_s1 + $0x1ac] ss:$16 sps:$4 sm:$0xff]   ;;  %v4611_v5 = vld [vmem:[%s6218_s1 + $0x1a8] ss:$16 sps:$4 sm:$0xff]  }
  0x4f   : > { %1878 = vmatprep.subr.bf16.mxu0 %v4557_v29  ;;  %1898 = vmatprep.mubr.bf16.mxu0 %v4624_v2  ;;  %v4614_v6 = vld [vmem:[%s6218_s1 + $0x1c0] ss:$16 sps:$4 sm:$0xff]   ;;  %v4615_v7 = vld [vmem:[%s6218_s1 + $0x1e4] ss:$16 sps:$4 sm:$0xff]   ;;  %v4620_v8 = vld [vmem:[%s6218_s1 + $0x1cc] ss:$16 sps:$4 sm:$0xff]  }
  0x50   : > { %4060 = vmatmul.mubr.msk.bf16.gmra.mrb[8].mxu1 %vm1841_vm0, %v4552_v25  ;;  %v4617_v9 = vld [vmem:[%s5244_s23 + $0x1a0] ss:$28 sps:$4 sm:$0xff]   ;;  %v4618_v10 = vld [vmem:[%s6218_s1 + $0x1c8] ss:$16 sps:$4 sm:$0xff]   ;;  %v4627_v12 = vld [vmem:[%s6218_s1 + $0x204] ss:$16 sps:$4 sm:$0xff]  }
  0x51   : > { %2327 = vmatpush1.bf16.msra.mxu1 %v4553_v27  ;;  %2267 = vmatprep.mubr.bf16.mxu1 %v5099_v1  ;;  %v4621_v11 = vld [vmem:[%s6218_s1 + $0x1e0] ss:$16 sps:$4 sm:$0xff]   ;;  %v4630_v13 = vld [vmem:[%s6218_s1 + $0x1ec] ss:$16 sps:$4 sm:$0xff]   ;;  %v4628_v16 = vld [vmem:[%s6218_s1 + $0x1e8] ss:$16 sps:$4 sm:$0xff]  }
  0x52   : > { %2328 = vmatprep.subr.bf16.mxu1 %v4561_v30  ;;  %1879 = vmatpush1.bf16.msra.mxu0 %v4562_v32  ;;  %v4622_v14 = vld [vmem:[%s5244_s23] ss:$28 sps:$4 sm:$0xff]   ;;  %v4633_v17 = vld [vmem:[%s6218_s1 + $0x224] ss:$16 sps:$4 sm:$0xff]   ;;  %v4634_v21 = vld [vmem:[%s6218_s1 + $0x208] ss:$16 sps:$4 sm:$0xff]  }
  0x53   : > { %1880 = vmatprep.subr.bf16.mxu0 %v4563_v33  ;;  %v4625_v15 = vld [vmem:[%s6218_s1 + $0x200] ss:$16 sps:$4 sm:$0xff]   ;;  %v4636_v18 = vld [vmem:[%s6218_s1 + $0x20c] ss:$16 sps:$4 sm:$0xff]   ;;  %v4642_v22 = vld [vmem:[%s6218_s1 + $0x244] ss:$16 sps:$4 sm:$0xff]  }
  0x54   : > { %v4637_v19 = vld [vmem:[%s5244_s23 + $0x3c] ss:$28 sps:$4 sm:$0xff]   ;;  %v4631_v20 = vld [vmem:[%s6218_s1 + $0x220] ss:$16 sps:$4 sm:$0xff]   ;;  %v4648_v27 = vld [vmem:[%s6218_s1 + $0x264] ss:$16 sps:$4 sm:$0xff]  }
  0x55   : > { %2329 = vmatpush1.bf16.msra.mxu1 %v4559_v31  ;;  %v4645_v23 = vld [vmem:[%s6218_s1 + $0x22c] ss:$16 sps:$4 sm:$0xff]   ;;  %v4639_v24 = vld [vmem:[%s5244_s23 + $0x38] ss:$28 sps:$4 sm:$0xff]   ;;  %v4640_v25 = vld [vmem:[%s6218_s1 + $0x240] ss:$16 sps:$4 sm:$0xff]  }
  0x56   : > { %2330 = vmatprep.subr.bf16.mxu1 %v4568_v34  ;;  %1881 = vmatpush1.bf16.msra.mxu0 %v4569_v37  ;;  %v4643_v26 = vld [vmem:[%s6218_s1 + $0x228] ss:$16 sps:$4 sm:$0xff]   ;;  %v4651_v28 = vld [vmem:[%s6218_s1 + $0x24c] ss:$16 sps:$4 sm:$0xff]   ;;  %v4652_v29 = vld [vmem:[%s5244_s23 + $0x74] ss:$28 sps:$4 sm:$0xff]  }
  0x57   : > { %1882 = vmatprep.subr.bf16.mxu0 %v4570_v38  ;;  %v4646_v30 = vld [vmem:[%s6218_s1 + $0x260] ss:$16 sps:$4 sm:$0xff]   ;;  %v4649_v31 = vld [vmem:[%s6218_s1 + $0x248] ss:$16 sps:$4 sm:$0xff]   ;;  %v4657_v32 = vld [vmem:[%s6218_s1 + $0x284] ss:$16 sps:$4 sm:$0xff]  }
  0x58   : > { %4061 = vmatmul.mubr.msk.bf16.gmra.mrb[12].mxu1 %vm1841_vm0, %v4565_v35  ;;  %v4660_v33 = vld [vmem:[%s6218_s1 + $0x26c] ss:$16 sps:$4 sm:$0xff]   ;;  %v4655_v35 = vld [vmem:[%s6218_s1 + $0x280] ss:$16 sps:$4 sm:$0xff]   ;;  %v4663_v37 = vld [vmem:[%s6218_s1 + $0x2a4] ss:$16 sps:$4 sm:$0xff]  }
  0x59   : > { %2331 = vmatpush1.bf16.msra.mxu1 %v4566_v36  ;;  %2277 = vmatprep.mubr.bf16.mxu1 %v5099_v1  ;;  %v4654_v34 = vld [vmem:[%s5244_s23 + $0x70] ss:$28 sps:$4 sm:$0xff]   ;;  %v4658_v36 = vld [vmem:[%s6218_s1 + $0x268] ss:$16 sps:$4 sm:$0xff]   ;;  %s290_s30 = scalar_lea.vmem [#allocation6], %s289_s25  ;;  %s3719_s14 = scalar_lea.sflag [#allocation5], %s289_s25 }
  0x5a   : > { %2332 = vmatprep.subr.bf16.mxu1 %v4574_v39  ;;  %1883 = vmatpush1.bf16.msra.mxu0 %v4575_v41  ;;  %v4666_v38 = vld [vmem:[%s6218_s1 + $0x28c] ss:$16 sps:$4 sm:$0xff]   ;;  %v4664_v41 = vld [vmem:[%s6218_s1 + $0x288] ss:$16 sps:$4 sm:$0xff]   ;;  %s3731_s9 = sshll.u32 %s290_s30, 4  ;;  %p6235_p9 = scmp.ne.s32.totalorder %s6228_s12, 0  ;;  %s6177_s9 = int_to_ptr.vmem [resolvable:$true] %s3731_s9 }
  0x5b   : > { %1884 = vmatprep.subr.bf16.mxu0 %v4576_v42  ;;  %v4667_v39 = vld [vmem:[%s5244_s23 + $0xac] ss:$28 sps:$4 sm:$0xff]   ;;  %v4672_v42 = vld [vmem:[%s6218_s1 + $0x2c4] ss:$16 sps:$4 sm:$0xff]   ;;  %s5028_s17 = scalar_lea.vmem %s6177_s9, 16  ;;  %s5101_s19 = smov [#allocation6]  }
  0x5c   : > { %p5029_p6 = scmp.ne.s32.totalorder %s6177_s9, %s5028_s17  ;;  %s5032_s20 = sshll.u32 %s5101_s19, 4  ;;  %s5033_s20 = int_to_ptr.vmem [resolvable:$false] %s5032_s20 }
  0x5d   : > { %2333 = vmatpush1.bf16.msra.mxu1 %v4572_v40  ;;  %v4661_v40 = vld [vmem:[%s6218_s1 + $0x2a0] ss:$16 sps:$4 sm:$0xff]   ;;  %s5034_s21 = scalar_lea.vmem %s5033_s20, 32  ;;  %p5035_p2 = scmp.lt.s32.totalorder %s6177_s9, %s5033_s20 }
  0x5e   : > { %2334 = vmatprep.subr.bf16.mxu1 %v4581_v43  ;;  %1885 = vmatpush1.bf16.msra.mxu0 %v4582_v46  ;;  %v4675_v43 = vld [vmem:[%s6218_s1 + $0x2ac] ss:$16 sps:$4 sm:$0xff]   ;;  %v4673_v46 = vld [vmem:[%s6218_s1 + $0x2a8] ss:$16 sps:$4 sm:$0xff]   ;;  %p5030_p10 = pnand %p5029_p6, %p6235_p9  ;;  %p5036_p3 = scmp.lt.s32.totalorder %s5034_s21, %s5028_s17 }
  0x5f   : > { %1886 = vmatprep.subr.bf16.mxu0 %v4583_v47  ;;  %v4678_v47 = vld [vmem:[%s6218_s1 + $0x2e4] ss:$16 sps:$4 sm:$0xff]  }
  0x60   : > { %4062 = vmatmul.mubr.msk.bf16.gmra.mrb[16].mxu1 %vm1841_vm0, %v4578_v44  ;;  %v4669_v44 = vld [vmem:[%s5244_s23 + $0xa8] ss:$28 sps:$4 sm:$0xff]   ;;  %p5031_p12 = pneg %p5030_p10  ;;  %p5037_p4 = por %p5036_p3, %p5035_p2 }
  0x61   : > { %2335 = vmatpush1.bf16.msra.mxu1 %v4579_v45  ;;  %2287 = vmatprep.mubr.bf16.mxu1 %v5099_v1  ;;  %v4670_v45 = vld [vmem:[%s6218_s1 + $0x2c0] ss:$16 sps:$4 sm:$0xff]  }
  0x62   : > { %2336 = vmatprep.subr.bf16.mxu1 %v4587_v48  ;;  %1887 = vmatpush1.bf16.msra.mxu0 %v4588_v50  ;;  %v4681_v48 = vld [vmem:[%s6218_s1 + $0x2cc] ss:$16 sps:$4 sm:$0xff]   ;;  %v4676_v50 = vld [vmem:[%s6218_s1 + $0x2e0] ss:$16 sps:$4 sm:$0xff]   ;;  %p5038_p7 = pnand %p5037_p4, %p5031_p12 }
  0x63   : > { %1888 = vmatprep.subr.bf16.mxu0 %v4589_v51  ;;  %v4679_v51 = vld [vmem:[%s6218_s1 + $0x2c8] ss:$16 sps:$4 sm:$0xff]  }
  0x65   : > { %2337 = vmatpush1.bf16.msra.mxu1 %v4585_v49  ;;  %v4682_v49 = vld [vmem:[%s5244_s23 + $0xe4] ss:$28 sps:$4 sm:$0xff]  }
  0x66   : > { %2338 = vmatprep.subr.bf16.mxu1 %v4594_v52  ;;  %1889 = vmatpush1.bf16.msra.mxu0 %v4595_v55  ;;  %v4687_v52 = vld [vmem:[%s6218_s1 + $0x304] ss:$16 sps:$4 sm:$0xff]   ;;  %v4685_v55 = vld [vmem:[%s6218_s1 + $0x300] ss:$16 sps:$4 sm:$0xff]  }
  0x67   : > { %1890 = vmatprep.subr.bf16.mxu0 %v4596_v56  ;;  %v4688_v56 = vld [vmem:[%s6218_s1 + $0x2e8] ss:$16 sps:$4 sm:$0xff]  }
  0x68   : > { %4063 = vmatmul.mubr.msk.bf16.gmra.mrb[20].mxu1 %vm1841_vm0, %v4591_v53  ;;  %v4690_v53 = vld [vmem:[%s6218_s1 + $0x2ec] ss:$16 sps:$4 sm:$0xff]  }
  0x69   : > { %2339 = vmatpush1.bf16.msra.mxu1 %v4592_v54  ;;  %2297 = vmatprep.mubr.bf16.mxu1 %v5099_v1  ;;  %v4684_v54 = vld [vmem:[%s5244_s23 + $0xe0] ss:$28 sps:$4 sm:$0xff]  }
  0x6a   : > { %2340 = vmatprep.subr.bf16.mxu1 %v4600_v57  ;;  %1891 = vmatpush1.bf16.msra.mxu0 %v4601_v59  ;;  %v4693_v57 = vld [vmem:[%s6218_s1 + $0x324] ss:$16 sps:$4 sm:$0xff]   ;;  %v4697_v59 = vld [vmem:[%s5244_s23 + $0x11c] ss:$28 sps:$4 sm:$0xff]  }
  0x6b   : > { %1892 = vmatprep.subr.bf16.mxu0 %v4602_v60  ;;  %v4691_v60 = vld [vmem:[%s6218_s1 + $0x320] ss:$16 sps:$4 sm:$0xff]  }
  0x6d   : > { %2341 = vmatpush1.bf16.msra.mxu1 %v4598_v58  ;;  %v4696_v58 = vld [vmem:[%s6218_s1 + $0x30c] ss:$16 sps:$4 sm:$0xff]  }
  0x6e   : > { %2342 = vmatprep.subr.bf16.mxu1 %v4607_v61  ;;  %1893 = vmatpush1.bf16.msra.mxu0 %v4608_v0  ;;  %v4694_v61 = vld [vmem:[%s6218_s1 + $0x308] ss:$16 sps:$4 sm:$0xff]  }
  0x6f   : > { %1894 = vmatprep.subr.bf16.mxu0 %v4609_v3  ;;  %v4699_v0 = vld [vmem:[%s5244_s23 + $0x118] ss:$28 sps:$4 sm:$0xff]  }
  0x70   : > { %4064 = vmatmul.mubr.msk.bf16.gmra.mrb[24].mxu1 %vm1841_vm0, %v4604_v62  ;;  %v4702_v62 = vld [vmem:[%s6218_s1 + $0x344] ss:$16 sps:$4 sm:$0xff]   ;;  %v4703_v3 = vld [vmem:[%s6218_s1 + $0x328] ss:$16 sps:$4 sm:$0xff]  }
  0x71   : > { %2343 = vmatpush1.bf16.msra.mxu1 %v4605_v63  ;;  %2307 = vmatprep.mubr.bf16.mxu1 %v5099_v1  ;;  %v4705_v63 = vld [vmem:[%s6218_s1 + $0x32c] ss:$16 sps:$4 sm:$0xff]  }
  0x72   : > { %2344 = vmatprep.subr.bf16.mxu1 %v4613_v4  ;;  %1895 = vmatpush1.bf16.msra.mxu0 %v4614_v6  ;;  %v4708_v4 = vld [vmem:[%s6218_s1 + $0x364] ss:$16 sps:$4 sm:$0xff]  }
  0x73   : > { %1896 = vmatprep.subr.bf16.mxu0 %v4615_v7  ;;  %v4712_v6 = vld [vmem:[%s5244_s23 + $0x154] ss:$28 sps:$4 sm:$0xff]  }
  0x74   : > { %v4706_v7 = vld [vmem:[%s6218_s1 + $0x360] ss:$16 sps:$4 sm:$0xff]  }
  0x75   : > { %2345 = vmatpush1.bf16.msra.mxu1 %v4611_v5  ;;  %v4711_v5 = vld [vmem:[%s6218_s1 + $0x34c] ss:$16 sps:$4 sm:$0xff]  }
  0x76   : > { %2346 = vmatprep.subr.bf16.mxu1 %v4620_v8  ;;  %1897 = vmatpush1.bf16.msra.mxu0 %v4621_v11  ;;  %v4709_v8 = vld [vmem:[%s6218_s1 + $0x348] ss:$16 sps:$4 sm:$0xff]   ;;  %v4714_v11 = vld [vmem:[%s5244_s23 + $0x150] ss:$28 sps:$4 sm:$0xff]  }
  0x77   : > { %1979 = vmatprep.subr.bf16.mxu0 %v4627_v12  ;;  %v4715_v12 = vld [vmem:[%s6218_s1 + $0x380] ss:$16 sps:$4 sm:$0xff]  }
  0x78   : > { %4065 = vmatmul.mubr.msk.bf16.gmra.mrb[28].mxu1 %vm1841_vm0, %v4617_v9  ;;  %v4717_v9 = vld [vmem:[%s6218_s1 + $0x384] ss:$16 sps:$4 sm:$0xff]  }
  0x79   : > { %2347 = vmatpush1.bf16.msra.mxu1 %v4618_v10  ;;  %2350 = vmatprep.mubr.bf16.mxu1 %v4624_v2  ;;  %v4700_v2 = vld [vmem:[%s6218_s1 + $0x340] ss:$16 sps:$4 sm:$0xff]   ;;  %v4720_v10 = vld [vmem:[%s6218_s1 + $0x36c] ss:$16 sps:$4 sm:$0xff]  }
  0x7a   : > { %2348 = vmatprep.subr.bf16.mxu1 %v4630_v13  ;;  %1899 = vmatmul.mubr.bf16.vlgmr.msra.gmra.mrb[0].mxu0 %v4622_v14  ;;  %v4718_v13 = vld [vmem:[%s6218_s1 + $0x368] ss:$16 sps:$4 sm:$0xff]  }
  0x7b   : > { %1980 = vmatpush1.bf16.msra.mxu0 %v4625_v15  ;;  %1908 = vmatprep.mubr.bf16.mxu0 %v4637_v19  ;;  %v4726_v15 = vld [vmem:[%s6218_s1 + $0x38c] ss:$16 sps:$4 sm:$0xff]  }
  0x7c   : > { %1981 = vmatprep.subr.bf16.mxu0 %v4633_v17  ;;  %v4721_v17 = vld [vmem:[%s6218_s1 + $0x3a0] ss:$16 sps:$4 sm:$0xff]  }
  0x7d   : > { %2349 = vmatpush1.bf16.msra.mxu1 %v4628_v16  ;;  %v4727_v16 = vld [vmem:[%s5244_s23 + $0x18c] ss:$28 sps:$4 sm:$0xff]  }
  0x7e   : > { %2431 = vmatprep.subr.bf16.mxu1 %v4636_v18  ;;  %v4724_v18 = vld [vmem:[%s6218_s1 + $0x388] ss:$16 sps:$4 sm:$0xff]  }
  0x7f   : > { %1982 = vmatpush1.bf16.msra.mxu0 %v4631_v20  ;;  %v4735_v20 = vld [vmem:[%s6218_s1 + $0x3ac] ss:$16 sps:$4 sm:$0xff]  }
  0x80   : > { %2351 = vmatmul.mubr.bf16.vlgmr.msra.gmra.mrb[32].mxu1 %v4622_v14  ;;  %1983 = vmatprep.subr.bf16.mxu0 %v4642_v22  ;;  %v4723_v14 = vld [vmem:[%s6218_s1 + $0x3a4] ss:$16 sps:$4 sm:$0xff]   ;;  %v4730_v22 = vld [vmem:[%s6218_s1 + $0x3c0] ss:$16 sps:$4 sm:$0xff]  }
  0x81   : > { %2432 = vmatpush1.bf16.msra.mxu1 %v4634_v21  ;;  %2360 = vmatprep.mubr.bf16.mxu1 %v4637_v19  ;;  %v4732_v19 = vld [vmem:[%s6218_s1 + $0x3c4] ss:$16 sps:$4 sm:$0xff]  }
  0x82   : > { %2433 = vmatprep.subr.bf16.mxu1 %v4645_v23  ;;  %1909 = vmatmul.mubr.bf16.gmra.mrb[4].mxu0 %v4639_v24  ;;  %v4729_v21 = vld [vmem:[%s5244_s23 + $0x188] ss:$28 sps:$4 sm:$0xff]  }
  0x83   : > { %1984 = vmatpush1.bf16.msra.mxu0 %v4640_v25  ;;  %1918 = vmatprep.mubr.bf16.mxu0 %v4652_v29  ;;  %v4733_v23 = vld [vmem:[%s6218_s1 + $0x3a8] ss:$16 sps:$4 sm:$0xff]   ;;  %v4741_v25 = vld [vmem:[%s6218_s1 + $0x3cc] ss:$16 sps:$4 sm:$0xff]  }
  0x84   : > { %1985 = vmatprep.subr.bf16.mxu0 %v4648_v27  ;;  %v4736_v27 = vld [vmem:[%s6218_s1 + $0x3e0] ss:$16 sps:$4 sm:$0xff]  }
  0x85   : > { %2434 = vmatpush1.bf16.msra.mxu1 %v4643_v26  ;;  %v4744_v26 = vld [vmem:[%s5244_s23 + $0xc] ss:$28 sps:$4 sm:$0xff]  }
  0x86   : > { %2435 = vmatprep.subr.bf16.mxu1 %v4651_v28  ;;  %v4739_v28 = vld [vmem:[%s6218_s1 + $0x3c8] ss:$16 sps:$4 sm:$0xff]  }
  0x87   : > { %1986 = vmatpush1.bf16.msra.mxu0 %v4646_v30  ;;  %v4750_v30 = vld [vmem:[%s6218_s1 + $0x3ec] ss:$16 sps:$4 sm:$0xff]  }
  0x88   : > { %2361 = vmatmul.mubr.bf16.gmra.mrb[36].mxu1 %v4639_v24  ;;  %1987 = vmatprep.subr.bf16.mxu0 %v4657_v32  ;;  %v4738_v24 = vld [vmem:[%s6218_s1 + $0x3e4] ss:$16 sps:$4 sm:$0xff]   ;;  %v4745_v32 = vld [vmem:[%s6218_s1 + $0x400] ss:$16 sps:$4 sm:$0xff]  }
  0x89   : > { %2436 = vmatpush1.bf16.msra.mxu1 %v4649_v31  ;;  %2370 = vmatprep.mubr.bf16.mxu1 %v4652_v29  ;;  %v4747_v29 = vld [vmem:[%s6218_s1 + $0x404] ss:$16 sps:$4 sm:$0xff]  }
  0x8a   : > { %2437 = vmatprep.subr.bf16.mxu1 %v4660_v33  ;;  %1919 = vmatmul.mubr.bf16.gmra.mrb[8].mxu0 %v4654_v34  ;;  %v4742_v31 = vld [vmem:[%s5244_s23 + $0x8] ss:$28 sps:$4 sm:$0xff]  }
  0x8b   : > { %1988 = vmatpush1.bf16.msra.mxu0 %v4655_v35  ;;  %1928 = vmatprep.mubr.bf16.mxu0 %v4667_v39  ;;  %v4748_v33 = vld [vmem:[%s6218_s1 + $0x3e8] ss:$16 sps:$4 sm:$0xff]   ;;  %v4756_v35 = vld [vmem:[%s6218_s1 + $0x40c] ss:$16 sps:$4 sm:$0xff]  }
  0x8c   : > { %1989 = vmatprep.subr.bf16.mxu0 %v4663_v37  ;;  %v4751_v37 = vld [vmem:[%s6218_s1 + $0x420] ss:$16 sps:$4 sm:$0xff]  }
  0x8d   : > { %2438 = vmatpush1.bf16.msra.mxu1 %v4658_v36  ;;  %v4757_v36 = vld [vmem:[%s5244_s23 + $0x44] ss:$28 sps:$4 sm:$0xff]  }
  0x8e   : > { %2439 = vmatprep.subr.bf16.mxu1 %v4666_v38  ;;  %v4754_v38 = vld [vmem:[%s6218_s1 + $0x408] ss:$16 sps:$4 sm:$0xff]  }
  0x8f   : > { %1990 = vmatpush1.bf16.msra.mxu0 %v4661_v40  ;;  %v4765_v40 = vld [vmem:[%s6218_s1 + $0x42c] ss:$16 sps:$4 sm:$0xff]  }
  0x90   : > { %2371 = vmatmul.mubr.bf16.gmra.mrb[40].mxu1 %v4654_v34  ;;  %1991 = vmatprep.subr.bf16.mxu0 %v4672_v42  ;;  %v4753_v34 = vld [vmem:[%s6218_s1 + $0x424] ss:$16 sps:$4 sm:$0xff]   ;;  %v4760_v42 = vld [vmem:[%s6218_s1 + $0x440] ss:$16 sps:$4 sm:$0xff]  }
  0x91   : > { %2440 = vmatpush1.bf16.msra.mxu1 %v4664_v41  ;;  %2380 = vmatprep.mubr.bf16.mxu1 %v4667_v39  ;;  %v4762_v39 = vld [vmem:[%s6218_s1 + $0x444] ss:$16 sps:$4 sm:$0xff]   ;;  %v4759_v41 = vld [vmem:[%s5244_s23 + $0x40] ss:$28 sps:$4 sm:$0xff]  }
  0x92   : > { %2441 = vmatprep.subr.bf16.mxu1 %v4675_v43  ;;  %1929 = vmatmul.mubr.bf16.gmra.mrb[12].mxu0 %v4669_v44  ;;  %v4763_v43 = vld [vmem:[%s6218_s1 + $0x428] ss:$16 sps:$4 sm:$0xff]  }
  0x93   : > { %1992 = vmatpush1.bf16.msra.mxu0 %v4670_v45  ;;  %1938 = vmatprep.mubr.bf16.mxu0 %v4682_v49  ;;  %v4771_v45 = vld [vmem:[%s6218_s1 + $0x44c] ss:$16 sps:$4 sm:$0xff]  }
  0x94   : > { %1993 = vmatprep.subr.bf16.mxu0 %v4678_v47  ;;  %v4766_v47 = vld [vmem:[%s6218_s1 + $0x460] ss:$16 sps:$4 sm:$0xff]  }
  0x95   : > { %2442 = vmatpush1.bf16.msra.mxu1 %v4673_v46  ;;  %v4772_v46 = vld [vmem:[%s5244_s23 + $0x7c] ss:$28 sps:$4 sm:$0xff]  }
  0x96   : > { %2443 = vmatprep.subr.bf16.mxu1 %v4681_v48  ;;  %v4769_v48 = vld [vmem:[%s6218_s1 + $0x448] ss:$16 sps:$4 sm:$0xff]  }
  0x97   : > { %1994 = vmatpush1.bf16.msra.mxu0 %v4676_v50  ;;  %v4780_v50 = vld [vmem:[%s6218_s1 + $0x46c] ss:$16 sps:$4 sm:$0xff]  }
  0x98   : > { %2381 = vmatmul.mubr.bf16.gmra.mrb[44].mxu1 %v4669_v44  ;;  %1995 = vmatprep.subr.bf16.mxu0 %v4687_v52  ;;  %v4768_v44 = vld [vmem:[%s6218_s1 + $0x464] ss:$16 sps:$4 sm:$0xff]   ;;  %v4775_v52 = vld [vmem:[%s6218_s1 + $0x480] ss:$16 sps:$4 sm:$0xff]  }
  0x99   : > { %2444 = vmatpush1.bf16.msra.mxu1 %v4679_v51  ;;  %2390 = vmatprep.mubr.bf16.mxu1 %v4682_v49  ;;  %v4777_v49 = vld [vmem:[%s6218_s1 + $0x484] ss:$16 sps:$4 sm:$0xff]  }
  0x9a   : > { %2445 = vmatprep.subr.bf16.mxu1 %v4690_v53  ;;  %1939 = vmatmul.mubr.bf16.gmra.mrb[16].mxu0 %v4684_v54  ;;  %v4774_v51 = vld [vmem:[%s5244_s23 + $0x78] ss:$28 sps:$4 sm:$0xff]  }
  0x9b   : > { %1996 = vmatpush1.bf16.msra.mxu0 %v4685_v55  ;;  %1948 = vmatprep.mubr.bf16.mxu0 %v4697_v59  ;;  %v4778_v53 = vld [vmem:[%s6218_s1 + $0x468] ss:$16 sps:$4 sm:$0xff]   ;;  %v4786_v55 = vld [vmem:[%s6218_s1 + $0x48c] ss:$16 sps:$4 sm:$0xff]  }
  0x9c   : > { %1997 = vmatprep.subr.bf16.mxu0 %v4693_v57  ;;  %v4781_v57 = vld [vmem:[%s6218_s1 + $0x4a0] ss:$16 sps:$4 sm:$0xff]  }
  0x9d   : > { %2446 = vmatpush1.bf16.msra.mxu1 %v4688_v56  ;;  %v4787_v56 = vld [vmem:[%s5244_s23 + $0xb4] ss:$28 sps:$4 sm:$0xff]  }
  0x9e   : > { %2447 = vmatprep.subr.bf16.mxu1 %v4696_v58  ;;  %v4784_v58 = vld [vmem:[%s6218_s1 + $0x488] ss:$16 sps:$4 sm:$0xff]  }
  0x9f   : > { %1998 = vmatpush1.bf16.msra.mxu0 %v4691_v60  ;;  %v4795_v60 = vld [vmem:[%s6218_s1 + $0x4ac] ss:$16 sps:$4 sm:$0xff]  }
  0xa0   : > { %2391 = vmatmul.mubr.bf16.gmra.mrb[48].mxu1 %v4684_v54  ;;  %1999 = vmatprep.subr.bf16.mxu0 %v4702_v62  ;;  %v4783_v54 = vld [vmem:[%s6218_s1 + $0x4a4] ss:$16 sps:$4 sm:$0xff]   ;;  %v4790_v62 = vld [vmem:[%s6218_s1 + $0x4c0] ss:$16 sps:$4 sm:$0xff]  }
  0xa1   : > { %2448 = vmatpush1.bf16.msra.mxu1 %v4694_v61  ;;  %2400 = vmatprep.mubr.bf16.mxu1 %v4697_v59  ;;  %v4792_v59 = vld [vmem:[%s6218_s1 + $0x4c4] ss:$16 sps:$4 sm:$0xff]   ;;  %v4789_v61 = vld [vmem:[%s5244_s23 + $0xb0] ss:$28 sps:$4 sm:$0xff]  }
  0xa2   : > { %2449 = vmatprep.subr.bf16.mxu1 %v4705_v63  ;;  %1949 = vmatmul.mubr.bf16.gmra.mrb[20].mxu0 %v4699_v0  ;;  %v4793_v63 = vld [vmem:[%s6218_s1 + $0x4a8] ss:$16 sps:$4 sm:$0xff]  }
  0xa3   : > { %2000 = vmatpush1.bf16.msra.mxu0 %v4700_v2  ;;  %1958 = vmatprep.mubr.bf16.mxu0 %v4712_v6  ;;  %v4801_v2 = vld [vmem:[%s6218_s1 + $0x4cc] ss:$16 sps:$4 sm:$0xff]  }
  0xa4   : > { %2001 = vmatprep.subr.bf16.mxu0 %v4708_v4  ;;  %v4796_v4 = vld [vmem:[%s6218_s1 + $0x4e0] ss:$16 sps:$4 sm:$0xff]  }
  0xa5   : > { %2450 = vmatpush1.bf16.msra.mxu1 %v4703_v3  ;;  %v4802_v3 = vld [vmem:[%s5244_s23 + $0xec] ss:$28 sps:$4 sm:$0xff]  }
  0xa6   : > { %2451 = vmatprep.subr.bf16.mxu1 %v4711_v5  ;;  %v4799_v5 = vld [vmem:[%s6218_s1 + $0x4c8] ss:$16 sps:$4 sm:$0xff]  }
  0xa7   : > { %2002 = vmatpush1.bf16.msra.mxu0 %v4706_v7  ;;  %v4810_v7 = vld [vmem:[%s6218_s1 + $0x4ec] ss:$16 sps:$4 sm:$0xff]  }
  0xa8   : > { %2401 = vmatmul.mubr.bf16.gmra.mrb[52].mxu1 %v4699_v0  ;;  %2003 = vmatprep.subr.bf16.mxu0 %v4717_v9  ;;  %v4798_v0 = vld [vmem:[%s6218_s1 + $0x4e4] ss:$16 sps:$4 sm:$0xff]   ;;  %v4805_v9 = vld [vmem:[%s6218_s1 + $0x500] ss:$16 sps:$4 sm:$0xff]  }
  0xa9   : > { %2452 = vmatpush1.bf16.msra.mxu1 %v4709_v8  ;;  %2410 = vmatprep.mubr.bf16.mxu1 %v4712_v6  ;;  %v4807_v6 = vld [vmem:[%s6218_s1 + $0x504] ss:$16 sps:$4 sm:$0xff]  }
  0xaa   : > { %2453 = vmatprep.subr.bf16.mxu1 %v4720_v10  ;;  %1959 = vmatmul.mubr.bf16.gmra.mrb[24].mxu0 %v4714_v11  ;;  %v4804_v8 = vld [vmem:[%s5244_s23 + $0xe8] ss:$28 sps:$4 sm:$0xff]  }
  0xab   : > { %2004 = vmatpush1.bf16.msra.mxu0 %v4715_v12  ;;  %1968 = vmatprep.mubr.bf16.mxu0 %v4727_v16  ;;  %v4808_v10 = vld [vmem:[%s6218_s1 + $0x4e8] ss:$16 sps:$4 sm:$0xff]   ;;  %v4816_v12 = vld [vmem:[%s6218_s1 + $0x50c] ss:$16 sps:$4 sm:$0xff]  }
  0xac   : > { %2005 = vmatprep.subr.bf16.mxu0 %v4723_v14  ;;  %v4811_v14 = vld [vmem:[%s6218_s1 + $0x520] ss:$16 sps:$4 sm:$0xff]  }
  0xad   : > { %2454 = vmatpush1.bf16.msra.mxu1 %v4718_v13  ;;  %v4817_v13 = vld [vmem:[%s5244_s23 + $0x124] ss:$28 sps:$4 sm:$0xff]  }
  0xae   : > { %2455 = vmatprep.subr.bf16.mxu1 %v4726_v15  ;;  %v4814_v15 = vld [vmem:[%s6218_s1 + $0x508] ss:$16 sps:$4 sm:$0xff]  }
  0xaf   : > { %2006 = vmatpush1.bf16.msra.mxu0 %v4721_v17  ;;  %v4825_v17 = vld [vmem:[%s6218_s1 + $0x52c] ss:$16 sps:$4 sm:$0xff]  }
  0xb0   : > { %2411 = vmatmul.mubr.bf16.gmra.mrb[56].mxu1 %v4714_v11  ;;  %2007 = vmatprep.subr.bf16.mxu0 %v4732_v19  ;;  %v4813_v11 = vld [vmem:[%s6218_s1 + $0x524] ss:$16 sps:$4 sm:$0xff]   ;;  %v4820_v19 = vld [vmem:[%s6218_s1 + $0x540] ss:$16 sps:$4 sm:$0xff]  }
  0xb1   : > { %2456 = vmatpush1.bf16.msra.mxu1 %v4724_v18  ;;  %2420 = vmatprep.mubr.bf16.mxu1 %v4727_v16  ;;  %v4822_v16 = vld [vmem:[%s6218_s1 + $0x544] ss:$16 sps:$4 sm:$0xff]   ;;  %v4819_v18 = vld [vmem:[%s5244_s23 + $0x120] ss:$28 sps:$4 sm:$0xff]  }
  0xb2   : > { %2457 = vmatprep.subr.bf16.mxu1 %v4735_v20  ;;  %1969 = vmatmul.mubr.bf16.gmra.mrb[28].mxu0 %v4729_v21  ;;  %v4823_v20 = vld [vmem:[%s6218_s1 + $0x528] ss:$16 sps:$4 sm:$0xff]  }
  0xb3   : > { %2008 = vmatpush1.bf16.msra.mxu0 %v4730_v22  ;;  %2011 = vmatprep.mubr.bf16.mxu0 %v4744_v26  ;;  %v4831_v22 = vld [vmem:[%s6218_s1 + $0x54c] ss:$16 sps:$4 sm:$0xff]  }
  0xb4   : > { %2009 = vmatprep.subr.bf16.mxu0 %v4738_v24  ;;  %v4829_v24 = vld [vmem:[%s6218_s1 + $0x548] ss:$16 sps:$4 sm:$0xff]  }
  0xb5   : > { %2458 = vmatpush1.bf16.msra.mxu1 %v4733_v23  ;;  %v4826_v23 = vld [vmem:[%s6218_s1 + $0x560] ss:$16 sps:$4 sm:$0xff]  }
  0xb6   : > { %2459 = vmatprep.subr.bf16.mxu1 %v4741_v25  ;;  %v4832_v25 = vld [vmem:[%s5244_s23 + $0x15c] ss:$28 sps:$4 sm:$0xff]  }
  0xb7   : > { %2010 = vmatpush1.bf16.msra.mxu0 %v4736_v27  ;;  %v4840_v27 = vld [vmem:[%s6218_s1 + $0x56c] ss:$16 sps:$4 sm:$0xff]  }
  0xb8   : > { %2421 = vmatmul.mubr.bf16.gmra.mrb[60].mxu1 %v4729_v21  ;;  %2092 = vmatprep.subr.bf16.mxu0 %v4747_v29  ;;  %v4828_v21 = vld [vmem:[%s6218_s1 + $0x564] ss:$16 sps:$4 sm:$0xff]   ;;  %v4835_v29 = vld [vmem:[%s6218_s1 + $0x580] ss:$16 sps:$4 sm:$0xff]  }
  0xb9   : > { %2460 = vmatpush1.bf16.msra.mxu1 %v4739_v28  ;;  %2463 = vmatprep.mubr.bf16.mxu1 %v4744_v26  ;;  %v4837_v26 = vld [vmem:[%s6218_s1 + $0x584] ss:$16 sps:$4 sm:$0xff]  }
  0xba   : > { %2461 = vmatprep.subr.bf16.mxu1 %v4750_v30  ;;  %2012 = vmatmul.mubr.bf16.vlgmr.msra.gmra.mrb[0].mxu0 %v4742_v31  ;;  %v4834_v28 = vld [vmem:[%s5244_s23 + $0x158] ss:$28 sps:$4 sm:$0xff]  }
  0xbb   : > { %2093 = vmatpush1.bf16.msra.mxu0 %v4745_v32  ;;  %2021 = vmatprep.mubr.bf16.mxu0 %v4757_v36  ;;  %v4838_v30 = vld [vmem:[%s6218_s1 + $0x568] ss:$16 sps:$4 sm:$0xff]   ;;  %v4846_v32 = vld [vmem:[%s6218_s1 + $0x58c] ss:$16 sps:$4 sm:$0xff]  }
  0xbc   : > { %2094 = vmatprep.subr.bf16.mxu0 %v4753_v34  ;;  %v4841_v34 = vld [vmem:[%s6218_s1 + $0x5a0] ss:$16 sps:$4 sm:$0xff]  }
  0xbd   : > { %2462 = vmatpush1.bf16.msra.mxu1 %v4748_v33  ;;  %v4847_v33 = vld [vmem:[%s5244_s23 + $0x194] ss:$28 sps:$4 sm:$0xff]  }
  0xbe   : > { %2544 = vmatprep.subr.bf16.mxu1 %v4756_v35  ;;  %v4844_v35 = vld [vmem:[%s6218_s1 + $0x588] ss:$16 sps:$4 sm:$0xff]  }
  0xbf   : > { %2095 = vmatpush1.bf16.msra.mxu0 %v4751_v37  ;;  %v4855_v37 = vld [vmem:[%s6218_s1 + $0x5ac] ss:$16 sps:$4 sm:$0xff]  }
  0xc0   : > { %2464 = vmatmul.mubr.bf16.vlgmr.msra.gmra.mrb[32].mxu1 %v4742_v31  ;;  %2096 = vmatprep.subr.bf16.mxu0 %v4762_v39  ;;  %v4843_v31 = vld [vmem:[%s6218_s1 + $0x5a4] ss:$16 sps:$4 sm:$0xff]   ;;  %v4850_v39 = vld [vmem:[%s6218_s1 + $0x5c0] ss:$16 sps:$4 sm:$0xff]  }
  0xc1   : > { %2545 = vmatpush1.bf16.msra.mxu1 %v4754_v38  ;;  %2473 = vmatprep.mubr.bf16.mxu1 %v4757_v36  ;;  %v4852_v36 = vld [vmem:[%s6218_s1 + $0x5c4] ss:$16 sps:$4 sm:$0xff]   ;;  %v4849_v38 = vld [vmem:[%s5244_s23 + $0x190] ss:$28 sps:$4 sm:$0xff]  }
  0xc2   : > { %2546 = vmatprep.subr.bf16.mxu1 %v4765_v40  ;;  %2022 = vmatmul.mubr.bf16.gmra.mrb[4].mxu0 %v4759_v41  ;;  %v4853_v40 = vld [vmem:[%s6218_s1 + $0x5a8] ss:$16 sps:$4 sm:$0xff]  }
  0xc3   : > { %2097 = vmatpush1.bf16.msra.mxu0 %v4760_v42  ;;  %2031 = vmatprep.mubr.bf16.mxu0 %v4772_v46  ;;  %v4861_v42 = vld [vmem:[%s6218_s1 + $0x5cc] ss:$16 sps:$4 sm:$0xff]  }
  0xc4   : > { %2098 = vmatprep.subr.bf16.mxu0 %v4768_v44  ;;  %v4856_v44 = vld [vmem:[%s6218_s1 + $0x5e0] ss:$16 sps:$4 sm:$0xff]  }
  0xc5   : > { %2547 = vmatpush1.bf16.msra.mxu1 %v4763_v43  ;;  %v4864_v43 = vld [vmem:[%s5244_s23 + $0x14] ss:$28 sps:$4 sm:$0xff]  }
  0xc6   : > { %2548 = vmatprep.subr.bf16.mxu1 %v4771_v45  ;;  %v4859_v45 = vld [vmem:[%s6218_s1 + $0x5c8] ss:$16 sps:$4 sm:$0xff]  }
  0xc7   : > { %2099 = vmatpush1.bf16.msra.mxu0 %v4766_v47  ;;  %v4862_v47 = vld [vmem:[%s5244_s23 + $0x10] ss:$28 sps:$4 sm:$0xff]  }
  0xc8   : > { %2474 = vmatmul.mubr.bf16.gmra.mrb[36].mxu1 %v4759_v41  ;;  %2100 = vmatprep.subr.bf16.mxu0 %v4777_v49  ;;  %v4858_v41 = vld [vmem:[%s6218_s1 + $0x5e4] ss:$16 sps:$4 sm:$0xff]   ;;  %v4865_v49 = vld [vmem:[%s6218_s1 + $0x5e8] ss:$16 sps:$4 sm:$0xff]  }
  0xc9   : > { %2549 = vmatpush1.bf16.msra.mxu1 %v4769_v48  ;;  %2483 = vmatprep.mubr.bf16.mxu1 %v4772_v46  ;;  %v4867_v46 = vld [vmem:[%s6218_s1 + $0x5ec] ss:$16 sps:$4 sm:$0xff]  }
  0xca   : > { %2550 = vmatprep.subr.bf16.mxu1 %v4780_v50  ;;  %2032 = vmatmul.mubr.bf16.gmra.mrb[8].mxu0 %v4774_v51  ;;  %v4894_v48 = vld [vmem:[#allocation3 + $0x4] ss:$8 sps:$4 sm:$0xff]  }
  0xcb   : > { %2101 = vmatpush1.bf16.msra.mxu0 %v4775_v52  ;;  %2041 = vmatprep.mubr.bf16.mxu0 %v4787_v56  ;;  %v4871_v50 = vld [vmem:[%s5244_s23 + $0x4c] ss:$28 sps:$4 sm:$0xff]  }
  0xcc   : > { %2102 = vmatprep.subr.bf16.mxu0 %v4783_v54  ;;  %v4892_v52 = vld [vmem:[#allocation3] ss:$8 sps:$4 sm:$0xff]  }
  0xcd   : > { %2551 = vmatpush1.bf16.msra.mxu1 %v4778_v53  ;;  %v4897_v53 = vld [vmem:[#allocation3 + $0x14] ss:$8 sps:$4 sm:$0xff]  }
  0xce   : > { %2552 = vmatprep.subr.bf16.mxu1 %v4786_v55  ;;  %v4868_v54 = vld [vmem:[%s6218_s1 + $0x608] ss:$16 sps:$4 sm:$0xff]  }
  0xcf   : > { %2103 = vmatpush1.bf16.msra.mxu0 %v4781_v57  ;;  %v4895_v55 = vld [vmem:[#allocation3 + $0x10] ss:$8 sps:$4 sm:$0xff]   ;;  %v4873_v57 = vld [vmem:[%s5244_s23 + $0x48] ss:$28 sps:$4 sm:$0xff]  }
  0xd0   : > { %2484 = vmatmul.mubr.bf16.gmra.mrb[40].mxu1 %v4774_v51  ;;  %2104 = vmatprep.subr.bf16.mxu0 %v4792_v59  ;;  %v4870_v51 = vld [vmem:[%s6218_s1 + $0x60c] ss:$16 sps:$4 sm:$0xff]  }
  0xd1   : > { %2553 = vmatpush1.bf16.msra.mxu1 %v4784_v58  ;;  %2493 = vmatprep.mubr.bf16.mxu1 %v4787_v56  ;;  %v4900_v56 = vld [vmem:[#allocation3 + $0x24] ss:$8 sps:$4 sm:$0xff]   ;;  %v4898_v59 = vld [vmem:[#allocation3 + $0x20] ss:$8 sps:$4 sm:$0xff]  }
  0xd2   : > { %2554 = vmatprep.subr.bf16.mxu1 %v4795_v60  ;;  %2042 = vmatmul.mubr.bf16.gmra.mrb[12].mxu0 %v4789_v61  ;;  %v4874_v58 = vld [vmem:[%s5244_s23 + $0x84] ss:$28 sps:$4 sm:$0xff]  }
  0xd3   : > { %2105 = vmatpush1.bf16.msra.mxu0 %v4790_v62  ;;  %2051 = vmatprep.mubr.bf16.mxu0 %v4802_v3  ;;  %v4903_v60 = vld [vmem:[#allocation3 + $0x34] ss:$8 sps:$4 sm:$0xff]   ;;  %v4906_v62 = vld [vmem:[#allocation3 + $0x44] ss:$8 sps:$4 sm:$0xff]  }
  0xd4   : > { %2106 = vmatprep.subr.bf16.mxu0 %v4798_v0  ;;  %v4877_v0 = vld [vmem:[%s5244_s23 + $0xbc] ss:$28 sps:$4 sm:$0xff]  }
  0xd5   : > { %2555 = vmatpush1.bf16.msra.mxu1 %v4793_v63  ;;  %v4876_v63 = vld [vmem:[%s5244_s23 + $0x80] ss:$28 sps:$4 sm:$0xff]  }
  0xd6   : > { %2556 = vmatprep.subr.bf16.mxu1 %v4801_v2  ;;  %v4904_v2 = vld [vmem:[#allocation3 + $0x40] ss:$8 sps:$4 sm:$0xff]  }
  0xd7   : > { %2107 = vmatpush1.bf16.msra.mxu0 %v4796_v4  ;;  %v4907_v4 = vld [vmem:[#allocation3 + $0x50] ss:$8 sps:$4 sm:$0xff]  }
  0xd8   : > { %2494 = vmatmul.mubr.bf16.gmra.mrb[44].mxu1 %v4789_v61  ;;  %2108 = vmatprep.subr.bf16.mxu0 %v4807_v6  ;;  %v4901_v61 = vld [vmem:[#allocation3 + $0x30] ss:$8 sps:$4 sm:$0xff]  }
  0xd9   : > { %2557 = vmatpush1.bf16.msra.mxu1 %v4799_v5  ;;  %2503 = vmatprep.mubr.bf16.mxu1 %v4802_v3  ;;  %v4909_v3 = vld [vmem:[#allocation3 + $0x54] ss:$8 sps:$4 sm:$0xff]   ;;  %v4912_v5 = vld [vmem:[#allocation3 + $0x64] ss:$8 sps:$4 sm:$0xff]  }
  0xda   : > { %2558 = vmatprep.subr.bf16.mxu1 %v4810_v7  ;;  %2052 = vmatmul.mubr.bf16.gmra.mrb[16].mxu0 %v4804_v8  ;;  %v4879_v6 = vld [vmem:[%s5244_s23 + $0xb8] ss:$28 sps:$4 sm:$0xff]  }
  0xdb   : > { %2109 = vmatpush1.bf16.msra.mxu0 %v4805_v9  ;;  %2061 = vmatprep.mubr.bf16.mxu0 %v4817_v13  ;;  %v4880_v7 = vld [vmem:[%s5244_s23 + $0xf4] ss:$28 sps:$4 sm:$0xff]  }
  0xdc   : > { %2110 = vmatprep.subr.bf16.mxu0 %v4813_v11 }
  0xdd   : > { %2559 = vmatpush1.bf16.msra.mxu1 %v4808_v10  ;;  %v4915_v10 = vld [vmem:[#allocation3 + $0x74] ss:$8 sps:$4 sm:$0xff]  }
  0xde   : > { %2560 = vmatprep.subr.bf16.mxu1 %v4816_v12 }
  0xdf   : > { %2111 = vmatpush1.bf16.msra.mxu0 %v4811_v14  ;;  %v4913_v14 = vld [vmem:[#allocation3 + $0x70] ss:$8 sps:$4 sm:$0xff]  }
  0xe0   : > { %2504 = vmatmul.mubr.bf16.gmra.mrb[48].mxu1 %v4804_v8  ;;  %2112 = vmatprep.subr.bf16.mxu0 %v4822_v16  ;;  %v4910_v8 = vld [vmem:[#allocation3 + $0x60] ss:$8 sps:$4 sm:$0xff]  }
  0xe1   : > { %2561 = vmatpush1.bf16.msra.mxu1 %v4814_v15  ;;  %2513 = vmatprep.mubr.bf16.mxu1 %v4817_v13  ;;  %v4918_v15 = vld [vmem:[#allocation3 + $0x84] ss:$8 sps:$4 sm:$0xff]  }
  0xe2   : > { %2562 = vmatprep.subr.bf16.mxu1 %v4825_v17  ;;  %2062 = vmatmul.mubr.bf16.gmra.mrb[20].mxu0 %v4819_v18  ;;  %v4882_v16 = vld [vmem:[%s5244_s23 + $0xf0] ss:$28 sps:$4 sm:$0xff]  }
  0xe3   : > { %2113 = vmatpush1.bf16.msra.mxu0 %v4820_v19  ;;  %2071 = vmatprep.mubr.bf16.mxu0 %v4832_v25  ;;  %v4883_v17 = vld [vmem:[%s5244_s23 + $0x12c] ss:$28 sps:$4 sm:$0xff]  }
  0xe4   : > { %2114 = vmatprep.subr.bf16.mxu0 %v4828_v21 }
  0xe5   : > { %2563 = vmatpush1.bf16.msra.mxu1 %v4823_v20  ;;  %v4921_v20 = vld [vmem:[#allocation3 + $0x94] ss:$8 sps:$4 sm:$0xff]  }
  0xe6   : > { %2564 = vmatprep.subr.bf16.mxu1 %v4831_v22 }
  0xe7   : > { %2115 = vmatpush1.bf16.msra.mxu0 %v4826_v23 }
  0xe8   : > { %2514 = vmatmul.mubr.bf16.gmra.mrb[52].mxu1 %v4819_v18  ;;  %2116 = vmatprep.subr.bf16.mxu0 %v4837_v26  ;;  %v4916_v18 = vld [vmem:[#allocation3 + $0x80] ss:$8 sps:$4 sm:$0xff]  }
  0xe9   : > { %2565 = vmatpush1.bf16.msra.mxu1 %v4829_v24  ;;  %2523 = vmatprep.mubr.bf16.mxu1 %v4832_v25  ;;  %v4919_v24 = vld [vmem:[#allocation3 + $0x90] ss:$8 sps:$4 sm:$0xff]   ;;  %v4924_v25 = vld [vmem:[#allocation3 + $0xa4] ss:$8 sps:$4 sm:$0xff]  }
  0xea   : > { %2566 = vmatprep.subr.bf16.mxu1 %v4840_v27  ;;  %2072 = vmatmul.mubr.bf16.gmra.mrb[24].mxu0 %v4834_v28  ;;  %v4885_v26 = vld [vmem:[%s5244_s23 + $0x128] ss:$28 sps:$4 sm:$0xff]  }
  0xeb   : > { %2117 = vmatpush1.bf16.msra.mxu0 %v4835_v29  ;;  %2081 = vmatprep.mubr.bf16.mxu0 %v4847_v33  ;;  %v4886_v27 = vld [vmem:[%s5244_s23 + $0x164] ss:$28 sps:$4 sm:$0xff]  }
  0xec   : > { %2118 = vmatprep.subr.bf16.mxu0 %v4843_v31 }
  0xed   : > { %2567 = vmatpush1.bf16.msra.mxu1 %v4838_v30  ;;  %v4927_v30 = vld [vmem:[#allocation3 + $0xb4] ss:$8 sps:$4 sm:$0xff]  }
  0xee   : > { %2568 = vmatprep.subr.bf16.mxu1 %v4846_v32 }
  0xef   : > { %2119 = vmatpush1.bf16.msra.mxu0 %v4841_v34  ;;  %v4925_v34 = vld [vmem:[#allocation3 + $0xb0] ss:$8 sps:$4 sm:$0xff]  }
  0xf0   : > { %2524 = vmatmul.mubr.bf16.gmra.mrb[56].mxu1 %v4834_v28  ;;  %2120 = vmatprep.subr.bf16.mxu0 %v4852_v36  ;;  %v4922_v28 = vld [vmem:[#allocation3 + $0xa0] ss:$8 sps:$4 sm:$0xff]  }
  0xf1   : > { %2569 = vmatpush1.bf16.msra.mxu1 %v4844_v35  ;;  %2533 = vmatprep.mubr.bf16.mxu1 %v4847_v33  ;;  %v4930_v35 = vld [vmem:[#allocation3 + $0xc4] ss:$8 sps:$4 sm:$0xff]   ;;  %v4888_v36 = vld [vmem:[%s5244_s23 + $0x160] ss:$28 sps:$4 sm:$0xff]  }
  0xf2   : > { %2570 = vmatprep.subr.bf16.mxu1 %v4855_v37  ;;  %2082 = vmatmul.mubr.bf16.gmra.mrb[28].mxu0 %v4849_v38  ;;  %v4889_v37 = vld [vmem:[%s5244_s23 + $0x19c] ss:$28 sps:$4 sm:$0xff]  }
  0xf3   : > { %2121 = vmatpush1.bf16.msra.mxu0 %v4850_v39  ;;  %2124 = vmatprep.mubr.bf16.mxu0 %v4864_v43 }
  0xf4   : > { %2122 = vmatprep.subr.bf16.mxu0 %v4858_v41 }
  0xf5   : > { %2571 = vmatpush1.bf16.msra.mxu1 %v4853_v40 }
  0xf6   : > { %2572 = vmatprep.subr.bf16.mxu1 %v4861_v42 }
  0xf7   : > { %2123 = vmatpush1.bf16.msra.mxu0 %v4856_v44 }
  0xf8   : > { %2534 = vmatmul.mubr.bf16.gmra.mrb[60].mxu1 %v4849_v38  ;;  %3326 = vmatprep.subr.bf16.mxu0 %v4894_v48  ;;  %v4928_v38 = vld [vmem:[#allocation3 + $0xc0] ss:$8 sps:$4 sm:$0xff]  }
  0xf9   : > { %2573 = vmatpush1.bf16.msra.mxu1 %v4859_v45  ;;  %2576 = vmatprep.mubr.bf16.mxu1 %v4864_v43  ;;  %v4891_v43 = vld [vmem:[%s5244_s23 + $0x198] ss:$28 sps:$4 sm:$0xff]  }
  0xfa   : > { %2574 = vmatprep.subr.bf16.mxu1 %v4867_v46  ;;  %2125 = vmatmul.mubr.bf16.vlgmr.msra.gmra.mrb[0].mxu0 %v4862_v47 }
  0xfb   : > { %2134 = vmatprep.mubr.bf16.mxu0 %v4871_v50  ;;  %3327 = vmatpush1.bf16.msra.mxu0 %v4892_v52  ;;  %v4992_v52 = vld [vmem:[%s5244_s23 + $0x18] ss:$28 sps:$4 sm:$0xff]  }
  0xfc   : > { %3328 = vmatprep.subr.bf16.mxu0 %v4897_v53 }
  0xfd   : > { %2575 = vmatpush1.bf16.msra.mxu1 %v4865_v49 }
  0xfe   : > { %2657 = vmatprep.subr.bf16.mxu1 %v4870_v51 }
  0xff   : > { %3329 = vmatpush1.bf16.msra.mxu0 %v4895_v55 }
 0x100   : > { %2577 = vmatmul.mubr.bf16.vlgmr.msra.gmra.mrb[32].mxu1 %v4862_v47  ;;  %3330 = vmatprep.subr.bf16.mxu0 %v4900_v56 }
 0x101   : > { %2658 = vmatpush1.bf16.msra.mxu1 %v4868_v54  ;;  %2586 = vmatprep.mubr.bf16.mxu1 %v4871_v50 }
 0x102   : > { %2135 = vmatmul.mubr.bf16.gmra.mrb[4].mxu0 %v4873_v57 }
 0x103   : > { %2144 = vmatprep.mubr.bf16.mxu0 %v4874_v58  ;;  %3331 = vmatpush1.bf16.msra.mxu0 %v4898_v59 }
 0x104   : > { %3332 = vmatprep.subr.bf16.mxu0 %v4903_v60 }
 0x107   : > { %3333 = vmatpush1.bf16.msra.mxu0 %v4901_v61 }
 0x108   : > { %2587 = vmatmul.mubr.bf16.gmra.mrb[36].mxu1 %v4873_v57  ;;  %3334 = vmatprep.subr.bf16.mxu0 %v4906_v62  ;;  %v4993_v57 = vld [vmem:[%s5244_s23 + $0x50] ss:$28 sps:$4 sm:$0xff]   ;;  %v4994_v62 = vld [vmem:[%s5244_s23 + $0x88] ss:$28 sps:$4 sm:$0xff]  }
 0x109   : > { %2596 = vmatprep.mubr.bf16.mxu1 %v4874_v58 }
 0x10a   : > { %2145 = vmatmul.mubr.bf16.gmra.mrb[8].mxu0 %v4876_v63 }
 0x10b   : > { %2154 = vmatprep.mubr.bf16.mxu0 %v4877_v0  ;;  %3335 = vmatpush1.bf16.msra.mxu0 %v4904_v2  ;;  %v4936_v2 = vld [vmem:[#allocation3 + $0xe4] ss:$8 sps:$4 sm:$0xff]  }
 0x10c   : > { %3336 = vmatprep.subr.bf16.mxu0 %v4909_v3  ;;  %v4934_v3 = vld [vmem:[#allocation3 + $0xe0] ss:$8 sps:$4 sm:$0xff]  }
 0x10f   : > { %3337 = vmatpush1.bf16.msra.mxu0 %v4907_v4  ;;  %v4995_v4 = vld [vmem:[%s5244_s23 + $0xc0] ss:$28 sps:$4 sm:$0xff]  }
 0x110   : > { %2597 = vmatmul.mubr.bf16.gmra.mrb[40].mxu1 %v4876_v63  ;;  %3338 = vmatprep.subr.bf16.mxu0 %v4912_v5  ;;  %v4933_v63 = vld [vmem:[#allocation3 + $0xd4] ss:$8 sps:$4 sm:$0xff]  }
 0x111   : > { %2606 = vmatprep.mubr.bf16.mxu1 %v4877_v0  ;;  %v4931_v0 = vld [vmem:[#allocation3 + $0xd0] ss:$8 sps:$4 sm:$0xff]   ;;  %v4939_v5 = vld [vmem:[#allocation3 + $0xf4] ss:$8 sps:$4 sm:$0xff]  }
 0x112   : > { %2155 = vmatmul.mubr.bf16.gmra.mrb[12].mxu0 %v4879_v6 }
 0x113   : > { %v5892_v9 = vpop.f32.mrb[0].mxu1  ;;  %2164 = vmatprep.mubr.bf16.mxu0 %v4880_v7  ;;  %3339 = vmatpush1.bf16.msra.mxu0 %v4910_v8  ;;  %v4996_v8 = vld [vmem:[%s5244_s23 + $0xf8] ss:$28 sps:$4 sm:$0xff]  }
 0x114   : > { %v5894_v11 = vpop.f32.mrb[1].mxu1  ;;  %3340 = vmatprep.subr.bf16.mxu0 %v4915_v10  ;;  %v4997_v10 = vld [vmem:[%s5244_s23 + $0x130] ss:$28 sps:$4 sm:$0xff]  }
 0x115   : > { %v5896_v12 = vpop.f32.mrb[2].mxu1 }
 0x116   : > { %v5898_v13 = vpop.f32.mrb[3].mxu1 }
 0x117   : > { %3341 = vmatpush1.bf16.msra.mxu0 %v4913_v14  ;;  %v4998_v14 = vld [vmem:[%s5244_s23 + $0x168] ss:$28 sps:$4 sm:$0xff]  }
 0x118   : > { %2607 = vmatmul.mubr.bf16.gmra.mrb[44].mxu1 %v4879_v6  ;;  %3342 = vmatprep.subr.bf16.mxu0 %v4918_v15  ;;  %v4937_v6 = vld [vmem:[#allocation3 + $0xf0] ss:$8 sps:$4 sm:$0xff]  }
 0x119   : > { %2616 = vmatprep.mubr.bf16.mxu1 %v4880_v7  ;;  %v4942_v7 = vld [vmem:[#allocation3 + $0x104] ss:$8 sps:$4 sm:$0xff]   ;;  %v4999_v15 = vld [vmem:[%s5244_s23 + $0x1a0] ss:$28 sps:$4 sm:$0xff]  }
 0x11a   : > { %2165 = vmatmul.mubr.bf16.gmra.mrb[16].mxu0 %v4882_v16 }
 0x11b   : > { %v5902_v19 = vpop.f32.mrb[4].mxu1  ;;  %2174 = vmatprep.mubr.bf16.mxu0 %v4883_v17  ;;  %3343 = vmatpush1.bf16.msra.mxu0 %v4916_v18 }
 0x11c   : > { %v5904_v21 = vpop.f32.mrb[5].mxu1  ;;  %3344 = vmatprep.subr.bf16.mxu0 %v4921_v20  ;;  %v5995_v20 = vld [vmem:[%s6219_s2] sm:$0xf] }
 0x11d   : > { %v5906_v22 = vpop.f32.mrb[6].mxu1 }
 0x11e   : > { %v5908_v23 = vpop.f32.mrb[7].mxu1 }
 0x11f   : > { %3345 = vmatpush1.bf16.msra.mxu0 %v4919_v24 }
 0x120   : > { %2617 = vmatmul.mubr.bf16.gmra.mrb[48].mxu1 %v4882_v16  ;;  %3346 = vmatprep.subr.bf16.mxu0 %v4924_v25  ;;  %v561_v16 = vlaneseq }
 0x121   : > { %2626 = vmatprep.mubr.bf16.mxu1 %v4883_v17 }
 0x122   : > { %2175 = vmatmul.mubr.bf16.gmra.mrb[20].mxu0 %v4885_v26  ;;  %v5987_v17 = vshrl.u32 %v561_v16, 7 }
 0x123   : > { %v5912_v29 = vpop.f32.mrb[8].mxu1  ;;  %2184 = vmatprep.mubr.bf16.mxu0 %v4886_v27  ;;  %3347 = vmatpush1.bf16.msra.mxu0 %v4922_v28 }
 0x124   : > { %v5914_v31 = vpop.f32.mrb[9].mxu1  ;;  %3348 = vmatprep.subr.bf16.mxu0 %v4927_v30  ;;  %v5990_v18 = vsub.s32 0, %v5987_v17  ;;  %v567_v24 = vsub.s32 1, %v5987_v17 }
 0x125   : > { %v5916_v32 = vpop.f32.mrb[10].mxu1 }
 0x126   : > { %v5918_v33 = vpop.f32.mrb[11].mxu1  ;;  %v6000_v25 = vrot.slane %v5995_v20, %v5990_v18 }
 0x127   : > { %3349 = vmatpush1.bf16.msra.mxu0 %v4925_v34 }
 0x128   : > { %2627 = vmatmul.mubr.bf16.gmra.mrb[52].mxu1 %v4885_v26  ;;  %3350 = vmatprep.subr.bf16.mxu0 %v4930_v35 }
 0x129   : > { %2636 = vmatprep.mubr.bf16.mxu1 %v4886_v27 }
 0x12a   : > { %2185 = vmatmul.mubr.bf16.gmra.mrb[24].mxu0 %v4888_v36 }
 0x12b   : > { %v5922_v39 = vpop.f32.mrb[12].mxu1  ;;  %2194 = vmatprep.mubr.bf16.mxu0 %v4889_v37  ;;  %3351 = vmatpush1.bf16.msra.mxu0 %v4928_v38 }
 0x12c   : > { %v5924_v40 = vpop.f32.mrb[13].mxu1  ;;  %3352 = vmatprep.subr.bf16.mxu0 %v4933_v63 }
 0x12d   : > { %v5926_v41 = vpop.f32.mrb[14].mxu1 }
 0x12e   : > { %v5928_v42 = vpop.f32.mrb[15].mxu1 }
 0x12f   : > { %3353 = vmatpush1.bf16.msra.mxu0 %v4931_v0 }
 0x130   : > { %2637 = vmatmul.mubr.bf16.gmra.mrb[56].mxu1 %v4888_v36  ;;  %3354 = vmatprep.subr.bf16.mxu0 %v4936_v2 }
 0x131   : > { %2646 = vmatprep.mubr.bf16.mxu1 %v4889_v37 }
 0x132   : > { %2195 = vmatmul.mubr.bf16.gmra.mrb[28].mxu0 %v4891_v43 }
 0x133   : > { %v5931_v44 = vpop.f32.mrb[16].mxu1  ;;  %3355 = vmatpush1.bf16.msra.mxu0 %v4934_v3 }
 0x134   : > { %v5933_v45 = vpop.f32.mrb[17].mxu1  ;;  %3356 = vmatprep.subr.bf16.mxu0 %v4939_v5 }
 0x135   : > { %v5935_v46 = vpop.f32.mrb[18].mxu1 }
 0x136   : > { %v5937_v47 = vpop.f32.mrb[19].mxu1 }
 0x137   : > { %3357 = vmatpush1.bf16.msra.mxu0 %v4937_v6 }
 0x138   : > { %2647 = vmatmul.mubr.bf16.gmra.mrb[60].mxu1 %v4891_v43  ;;  %3439 = vmatprep.subr.bf16.mxu0 %v4942_v7 }
 0x139   : > { %2689 = vmatprep.mubr.bf16.mxu1 %v5099_v1 }
 0x13b   : > { %v5940_v48 = vpop.f32.mrb[20].mxu1 }
 0x13c   : > { %v5942_v49 = vpop.f32.mrb[21].mxu1 }
 0x13d   : > { %v5944_v50 = vpop.f32.mrb[22].mxu1 }
 0x13e   : > { %v5946_v51 = vpop.f32.mrb[23].mxu1 }
 0x140   : > { %4066 = vmatmul.mubr.msk.bf16.vlgmr.msra.gmra.mrb[32].mxu1 %vm1841_vm0, %v4992_v52 }
 0x141   : > { %2699 = vmatprep.mubr.bf16.mxu1 %v5099_v1 }
 0x143   : > { %v5951_v53 = vpop.f32.mrb[24].mxu1 }
 0x144   : > { %v5953_v54 = vpop.f32.mrb[25].mxu1 }
 0x145   : > { %v5955_v55 = vpop.f32.mrb[26].mxu1 }
 0x146   : > { %v5957_v56 = vpop.f32.mrb[27].mxu1 }
 0x148   : > { %4067 = vmatmul.mubr.msk.bf16.gmra.mrb[36].mxu1 %vm1841_vm0, %v4993_v57 }
 0x149   : > { %2709 = vmatprep.mubr.bf16.mxu1 %v5099_v1 }
 0x14b   : > { %v5962_v58 = vpop.f32.mrb[28].mxu1 }
 0x14c   : > { %v5964_v59 = vpop.f32.mrb[29].mxu1 }
 0x14d   : > { %v5966_v60 = vpop.f32.mrb[30].mxu1 }
 0x14e   : > { %v5968_v61 = vpop.f32.mrb[31].mxu1 }
 0x150   : > { %4068 = vmatmul.mubr.msk.bf16.gmra.mrb[40].mxu1 %vm1841_vm0, %v4994_v62 }
 0x151   : > { %2719 = vmatprep.mubr.bf16.mxu1 %v5099_v1 }
 0x158   : > { %4069 = vmatmul.mubr.msk.bf16.gmra.mrb[44].mxu1 %vm1841_vm0, %v4995_v4 }
 0x159   : > { %2729 = vmatprep.mubr.bf16.mxu1 %v5099_v1 }
 0x160   : > { %4070 = vmatmul.mubr.msk.bf16.gmra.mrb[48].mxu1 %vm1841_vm0, %v4996_v8 }
 0x161   : > { %2739 = vmatprep.mubr.bf16.mxu1 %v5099_v1 }
 0x168   : > { %4071 = vmatmul.mubr.msk.bf16.gmra.mrb[52].mxu1 %vm1841_vm0, %v4997_v10 }
 0x169   : > { %2749 = vmatprep.mubr.bf16.mxu1 %v5099_v1 }
 0x170   : > { %4072 = vmatmul.mubr.msk.bf16.gmra.mrb[56].mxu1 %vm1841_vm0, %v4998_v14 }
 0x171   : > { %2759 = vmatprep.mubr.bf16.mxu1 %v5099_v1  ;;  %v6005_v1 = vrot.slane %v5995_v20, %v567_v24 }
 0x178   : > { %4073 = vmatmul.mubr.msk.bf16.gmra.mrb[60].mxu1 %vm1841_vm0, %v4999_v15 }
 0x1cd   : > { %v2126_v26 = vpop.f32.mrb[0].mxu0 }
 0x1ce   : > { %v4142_v27 = vadd.f32 %v2126_v26, %v6000_v25  ;;  %v2128_v28 = vpop.f32.mrb[1].mxu0 }
 0x1cf   : > { %v4144_v30 = vadd.f32 %v2128_v28, %v6005_v1  ;;  %v2130_v34 = vpop.f32.mrb[2].mxu0  ;;  %v4940_v28 = vld [vmem:[#allocation3 + $0x100] ss:$8 sps:$4 sm:$0xff]  }
 0x1d0   : > { %v4143_v35 = vadd.f32 %v4142_v27, %v5892_v9  ;;  %v4146_v36 = vadd.f32 %v2130_v34, %v6000_v25  ;;  %v2132_v37 = vpop.f32.mrb[3].mxu0 }
 0x1d1   : > { %v4145_v38 = vadd.f32 %v4144_v30, %v5894_v11  ;;  %v4148_v43 = vadd.f32 %v2132_v37, %v6005_v1 }
 0x1d2   : > { %v2770_v52 = vmul.f32 0.2, %v4143_v35  ;;  %v4147_v57 = vadd.f32 %v4146_v36, %v5896_v12 }
 0x1d3   : > { %v2771_v62 = vmul.f32 0.2, %v4145_v38  ;;  %v4149_v63 = vadd.f32 %v4148_v43, %v5898_v13 }
 0x1d4   : > { %v2774_v0 = vmul.f32 0.2, %v4147_v57  ;;  %v2834_v4 = vmax.f32 %v4143_v35, %v2770_v52  ;;  %v4945_v35 = vld [vmem:[#allocation3 + $0x114] ss:$8 sps:$4 sm:$0xff]   ;;  %v4943_v52 = vld [vmem:[#allocation3 + $0x110] ss:$8 sps:$4 sm:$0xff]  }
 0x1d5   : > { %v2775_v2 = vmul.f32 0.2, %v4149_v63  ;;  %v2136_v3 = vpop.f32.mrb[4].mxu0  ;;  %v2835_v7 = vmax.f32 %v4145_v38, %v2771_v62 }
 0x1d6   : > { %v2838_v5 = vmax.f32 %v4147_v57, %v2774_v0  ;;  %v4150_v9 = vadd.f32 %v2136_v3, %v6000_v25  ;;  %v2138_v6 = vpop.f32.mrb[5].mxu0  ;;  %v4948_v0 = vld [vmem:[#allocation3 + $0x124] ss:$8 sps:$4 sm:$0xff]  }
 0x1d7   : > { %v2839_v8 = vmax.f32 %v4149_v63, %v2775_v2  ;;  %v4152_v11 = vadd.f32 %v2138_v6, %v6005_v1  ;;  %v2140_v10 = vpop.f32.mrb[6].mxu0 }
 0x1d8   : > { %v2898_v14 = vpack.c.bf16 %v2838_v5, %v2834_v4  ;;  %v4151_v15 = vadd.f32 %v4150_v9, %v5902_v19  ;;  %v4154_v12 = vadd.f32 %v2140_v10, %v6000_v25  ;;  %v2142_v16 = vpop.f32.mrb[7].mxu0  ;;  %v4946_v10 = vld [vmem:[#allocation3 + $0x120] ss:$8 sps:$4 sm:$0xff]  }
 0x1d9   : > { %v4153_v13 = vadd.f32 %v4152_v11, %v5904_v21  ;;  %v4156_v26 = vadd.f32 %v2142_v16, %v6005_v1  ;;  %v2899_v27 = vpack.c.bf16 %v2839_v8, %v2835_v7 }
 0x1da   : > { %v2778_v30 = vmul.f32 0.2, %v4151_v15  ;;  %v4155_v34 = vadd.f32 %v4154_v12, %v5906_v22  ;;  %v4951_v12 = vld [vmem:[#allocation3 + $0x134] ss:$8 sps:$4 sm:$0xff]  }
 0x1db   : > { %v2779_v36 = vmul.f32 0.2, %v4153_v13  ;;  %v4157_v37 = vadd.f32 %v4156_v26, %v5908_v23  ;;  %3358 = vmatprep.mubr.bf16.mxu0 %v2899_v27 }
 0x1dc   : > { %v2782_v38 = vmul.f32 0.2, %v4155_v34  ;;  %3359 = vmatmul.mubr.bf16.vlgmr.msra.gmra.mrb[32].mxu0 %v2898_v14  ;;  %v2842_v57 = vmax.f32 %v4151_v15, %v2778_v30 }
 0x1dd   : > { %v2783_v19 = vmul.f32 0.2, %v4157_v37  ;;  %v2146_v43 = vpop.f32.mrb[8].mxu0  ;;  %3440 = vmatpush1.bf16.msra.mxu0 %v4940_v28  ;;  %v2843_v2 = vmax.f32 %v4153_v13, %v2779_v36  ;;  %v4954_v36 = vld [vmem:[#allocation3 + $0x144] ss:$8 sps:$4 sm:$0xff]  }
 0x1de   : > { %v2846_v21 = vmax.f32 %v4155_v34, %v2782_v38  ;;  %v4158_v62 = vadd.f32 %v2146_v43, %v6000_v25  ;;  %v2148_v63 = vpop.f32.mrb[9].mxu0  ;;  %3441 = vmatprep.subr.bf16.mxu0 %v4945_v35 }
 0x1df   : > { %v2847_v22 = vmax.f32 %v4157_v37, %v2783_v19  ;;  %v4160_v3 = vadd.f32 %v2148_v63, %v6005_v1  ;;  %v2150_v4 = vpop.f32.mrb[10].mxu0 }
 0x1e0   : > { %v4159_v23 = vadd.f32 %v4158_v62, %v5912_v29  ;;  %v4162_v5 = vadd.f32 %v2150_v4, %v6000_v25  ;;  %v2152_v9 = vpop.f32.mrb[11].mxu0  ;;  %v2902_v6 = vpack.c.bf16 %v2846_v21, %v2842_v57 }
 0x1e1   : > { %v4161_v7 = vadd.f32 %v4160_v3, %v5914_v31  ;;  %v4164_v8 = vadd.f32 %v2152_v9, %v6005_v1  ;;  %v2903_v11 = vpack.c.bf16 %v2847_v22, %v2843_v2  ;;  %3442 = vmatpush1.bf16.msra.mxu0 %v4943_v52  ;;  %v4949_v31 = vld [vmem:[#allocation3 + $0x130] ss:$8 sps:$4 sm:$0xff]   ;;  %v4957_v3 = vld [vmem:[#allocation3 + $0x154] ss:$8 sps:$4 sm:$0xff]  }
 0x1e2   : > { %v2786_v14 = vmul.f32 0.2, %v4159_v23  ;;  %v4163_v15 = vadd.f32 %v4162_v5, %v5916_v32  ;;  %3443 = vmatprep.subr.bf16.mxu0 %v4948_v0  ;;  %v4952_v0 = vld [vmem:[#allocation3 + $0x140] ss:$8 sps:$4 sm:$0xff]  }
 0x1e3   : > { %v2787_v16 = vmul.f32 0.2, %v4161_v7  ;;  %v4165_v13 = vadd.f32 %v4164_v8, %v5918_v33  ;;  %3368 = vmatprep.mubr.bf16.mxu0 %v2903_v11 }
 0x1e4   : > { %v2790_v29 = vmul.f32 0.2, %v4163_v15  ;;  %3369 = vmatmul.mubr.bf16.gmra.mrb[36].mxu0 %v2902_v6  ;;  %v2850_v28 = vmax.f32 %v4159_v23, %v2786_v14 }
 0x1e5   : > { %v2791_v26 = vmul.f32 0.2, %v4165_v13  ;;  %v2156_v27 = vpop.f32.mrb[12].mxu0  ;;  %3444 = vmatpush1.bf16.msra.mxu0 %v4946_v10  ;;  %v2851_v32 = vmax.f32 %v4161_v7, %v2787_v16  ;;  %v4960_v10 = vld [vmem:[#allocation3 + $0x164] ss:$8 sps:$4 sm:$0xff]  }
 0x1e6   : > { %v2854_v30 = vmax.f32 %v4163_v15, %v2790_v29  ;;  %v4166_v34 = vadd.f32 %v2156_v27, %v6000_v25  ;;  %v2158_v35 = vpop.f32.mrb[13].mxu0  ;;  %3445 = vmatprep.subr.bf16.mxu0 %v4951_v12 }
 0x1e7   : > { %v2855_v37 = vmax.f32 %v4165_v13, %v2791_v26  ;;  %v4168_v38 = vadd.f32 %v2158_v35, %v6005_v1  ;;  %v2160_v19 = vpop.f32.mrb[14].mxu0  ;;  %v4963_v35 = vld [vmem:[#allocation3 + $0x174] ss:$8 sps:$4 sm:$0xff]  }
 0x1e8   : > { %v4167_v33 = vadd.f32 %v4166_v34, %v5922_v39  ;;  %v4170_v43 = vadd.f32 %v2160_v19, %v6000_v25  ;;  %v2162_v52 = vpop.f32.mrb[15].mxu0  ;;  %v2906_v57 = vpack.c.bf16 %v2854_v30, %v2850_v28  ;;  %v4958_v28 = vld [vmem:[#allocation3 + $0x160] ss:$8 sps:$4 sm:$0xff]  }
 0x1e9   : > { %v4169_v21 = vadd.f32 %v4168_v38, %v5924_v40  ;;  %v4172_v62 = vadd.f32 %v2162_v52, %v6005_v1  ;;  %v2907_v63 = vpack.c.bf16 %v2855_v37, %v2851_v32  ;;  %3446 = vmatpush1.bf16.msra.mxu0 %v4949_v31  ;;  %v4955_v40 = vld [vmem:[#allocation3 + $0x150] ss:$8 sps:$4 sm:$0xff]  }
 0x1ea   : > { %v2794_v2 = vmul.f32 0.2, %v4167_v33  ;;  %v4171_v22 = vadd.f32 %v4170_v43, %v5926_v41  ;;  %3447 = vmatprep.subr.bf16.mxu0 %v4954_v36 }
 0x1eb   : > { %v2795_v4 = vmul.f32 0.2, %v4169_v21  ;;  %v4173_v23 = vadd.f32 %v4172_v62, %v5928_v42  ;;  %3378 = vmatprep.mubr.bf16.mxu0 %v2907_v63 }
 0x1ec   : > { %v2798_v39 = vmul.f32 0.2, %v4171_v22  ;;  %3379 = vmatmul.mubr.bf16.gmra.mrb[40].mxu0 %v2906_v57  ;;  %v2858_v6 = vmax.f32 %v4167_v33, %v2794_v2  ;;  %v4966_v57 = vld [vmem:[#allocation3 + $0x184] ss:$8 sps:$4 sm:$0xff]  }
 0x1ed   : > { %v2799_v5 = vmul.f32 0.2, %v4173_v23  ;;  %v2166_v9 = vpop.f32.mrb[16].mxu0  ;;  %3448 = vmatpush1.bf16.msra.mxu0 %v4952_v0  ;;  %v2859_v41 = vmax.f32 %v4169_v21, %v2795_v4 }
 0x1ee   : > { %v2862_v7 = vmax.f32 %v4171_v22, %v2798_v39  ;;  %v4174_v8 = vadd.f32 %v2166_v9, %v6000_v25  ;;  %v2168_v11 = vpop.f32.mrb[17].mxu0  ;;  %3449 = vmatprep.subr.bf16.mxu0 %v4957_v3  ;;  %v4964_v39 = vld [vmem:[#allocation3 + $0x180] ss:$8 sps:$4 sm:$0xff]  }
 0x1ef   : > { %v2863_v14 = vmax.f32 %v4173_v23, %v2799_v5  ;;  %v4176_v15 = vadd.f32 %v2168_v11, %v6005_v1  ;;  %v2170_v12 = vpop.f32.mrb[18].mxu0 }
 0x1f0   : > { %v4175_v42 = vadd.f32 %v4174_v8, %v5931_v44  ;;  %v4178_v16 = vadd.f32 %v2170_v12, %v6000_v25  ;;  %v2172_v13 = vpop.f32.mrb[19].mxu0  ;;  %v2910_v29 = vpack.c.bf16 %v2862_v7, %v2858_v6  ;;  %v4972_v12 = vld [vmem:[#allocation3 + $0x1a4] ss:$8 sps:$4 sm:$0xff]  }
 0x1f1   : > { %v4177_v26 = vadd.f32 %v4176_v15, %v5933_v45  ;;  %v4180_v27 = vadd.f32 %v2172_v13, %v6005_v1  ;;  %v2911_v31 = vpack.c.bf16 %v2863_v14, %v2859_v41  ;;  %3450 = vmatpush1.bf16.msra.mxu0 %v4955_v40  ;;  %v4961_v45 = vld [vmem:[#allocation3 + $0x170] ss:$8 sps:$4 sm:$0xff]   ;;  %v4969_v40 = vld [vmem:[#allocation3 + $0x194] ss:$8 sps:$4 sm:$0xff]  }
 0x1f2   : > { %v2802_v30 = vmul.f32 0.2, %v4175_v42  ;;  %v4179_v34 = vadd.f32 %v4178_v16, %v5935_v46  ;;  %3451 = vmatprep.subr.bf16.mxu0 %v4960_v10 }
 0x1f3   : > { %v2803_v36 = vmul.f32 0.2, %v4177_v26  ;;  %v4181_v32 = vadd.f32 %v4180_v27, %v5937_v47  ;;  %3388 = vmatprep.mubr.bf16.mxu0 %v2911_v31 }
 0x1f4   : > { %v2806_v44 = vmul.f32 0.2, %v4179_v34  ;;  %3389 = vmatmul.mubr.bf16.gmra.mrb[44].mxu0 %v2910_v29  ;;  %v2866_v19 = vmax.f32 %v4175_v42, %v2802_v30 }
 0x1f5   : > { %v2807_v37 = vmul.f32 0.2, %v4181_v32  ;;  %v2176_v38 = vpop.f32.mrb[20].mxu0  ;;  %3452 = vmatpush1.bf16.msra.mxu0 %v4958_v28  ;;  %v2867_v46 = vmax.f32 %v4177_v26, %v2803_v36 }
 0x1f6   : > { %v2870_v33 = vmax.f32 %v4179_v34, %v2806_v44  ;;  %v4182_v43 = vadd.f32 %v2176_v38, %v6000_v25  ;;  %v2178_v52 = vpop.f32.mrb[21].mxu0  ;;  %3453 = vmatprep.subr.bf16.mxu0 %v4963_v35  ;;  %v4970_v34 = vld [vmem:[#allocation3 + $0x1a0] ss:$8 sps:$4 sm:$0xff]  }
 0x1f7   : > { %v2871_v21 = vmax.f32 %v4181_v32, %v2807_v37  ;;  %v4184_v62 = vadd.f32 %v2178_v52, %v6005_v1  ;;  %v2180_v63 = vpop.f32.mrb[22].mxu0  ;;  %v4975_v32 = vld [vmem:[#allocation3 + $0x1b4] ss:$8 sps:$4 sm:$0xff]  }
 0x1f8   : > { %v4183_v47 = vadd.f32 %v4182_v43, %v5940_v48  ;;  %v4186_v0 = vadd.f32 %v2180_v63, %v6000_v25  ;;  %v2182_v2 = vpop.f32.mrb[23].mxu0  ;;  %v2914_v22 = vpack.c.bf16 %v2870_v33, %v2866_v19 }
 0x1f9   : > { %v4185_v3 = vadd.f32 %v4184_v62, %v5942_v49  ;;  %v4188_v4 = vadd.f32 %v2182_v2, %v6005_v1  ;;  %v2915_v23 = vpack.c.bf16 %v2871_v21, %v2867_v46  ;;  %3454 = vmatpush1.bf16.msra.mxu0 %v4961_v45  ;;  %v4967_v49 = vld [vmem:[#allocation3 + $0x190] ss:$8 sps:$4 sm:$0xff]  }
 0x1fa   : > { %v2810_v5 = vmul.f32 0.2, %v4183_v47  ;;  %v4187_v9 = vadd.f32 %v4186_v0, %v5944_v50  ;;  %3455 = vmatprep.subr.bf16.mxu0 %v4966_v57  ;;  %v4978_v57 = vld [vmem:[#allocation3 + $0x1c4] ss:$8 sps:$4 sm:$0xff]  }
 0x1fb   : > { %v2811_v6 = vmul.f32 0.2, %v4185_v3  ;;  %v4189_v7 = vadd.f32 %v4188_v4, %v5946_v51  ;;  %3398 = vmatprep.mubr.bf16.mxu0 %v2915_v23  ;;  %v4976_v4 = vld [vmem:[#allocation3 + $0x1c0] ss:$8 sps:$4 sm:$0xff]  }
 0x1fc   : > { %v2814_v48 = vmul.f32 0.2, %v4187_v9  ;;  %3399 = vmatmul.mubr.bf16.gmra.mrb[48].mxu0 %v2914_v22  ;;  %v2874_v10 = vmax.f32 %v4183_v47, %v2810_v5  ;;  %v571_v5 = vsub.s32 2, %v5987_v17 }
 0x1fd   : > { %v2815_v8 = vmul.f32 0.2, %v4189_v7  ;;  %v2186_v11 = vpop.f32.mrb[24].mxu0  ;;  %3456 = vmatpush1.bf16.msra.mxu0 %v4964_v39  ;;  %v2875_v50 = vmax.f32 %v4185_v3, %v2811_v6 }
 0x1fe   : > { %v2878_v41 = vmax.f32 %v4187_v9, %v2814_v48  ;;  %v4190_v14 = vadd.f32 %v2186_v11, %v6000_v25  ;;  %v2188_v15 = vpop.f32.mrb[25].mxu0  ;;  %3457 = vmatprep.subr.bf16.mxu0 %v4969_v40  ;;  %v4981_v9 = vld [vmem:[#allocation3 + $0x1d4] ss:$8 sps:$4 sm:$0xff]  }
 0x1ff   : > { %v2879_v42 = vmax.f32 %v4189_v7, %v2815_v8  ;;  %v4192_v16 = vadd.f32 %v2188_v15, %v6005_v1  ;;  %v2190_v13 = vpop.f32.mrb[26].mxu0  ;;  %v6074_v8 = vrot.slane %v5995_v20, %v571_v5  ;;  %v4982_v15 = vld [vmem:[#allocation3 + $0x1e0] ss:$8 sps:$4 sm:$0xff]  }
 0x200   : > { %v4191_v51 = vadd.f32 %v4190_v14, %v5951_v53  ;;  %v4194_v29 = vadd.f32 %v2190_v13, %v6000_v25  ;;  %v2192_v26 = vpop.f32.mrb[27].mxu0  ;;  %v2918_v27 = vpack.c.bf16 %v2878_v41, %v2874_v10 }
 0x201   : > { %v4193_v31 = vadd.f32 %v4192_v16, %v5953_v54  ;;  %v4196_v28 = vadd.f32 %v2192_v26, %v6005_v1  ;;  %v2919_v30 = vpack.c.bf16 %v2879_v42, %v2875_v50  ;;  %3458 = vmatpush1.bf16.msra.mxu0 %v4967_v49  ;;  %v4973_v54 = vld [vmem:[#allocation3 + $0x1b0] ss:$8 sps:$4 sm:$0xff]   ;;  %v4987_v42 = vld [vmem:[#allocation3 + $0x1f4] ss:$8 sps:$4 sm:$0xff]  }
 0x202   : > { %v2818_v35 = vmul.f32 0.2, %v4191_v51  ;;  %v4195_v36 = vadd.f32 %v4194_v29, %v5955_v55  ;;  %3459 = vmatprep.subr.bf16.mxu0 %v4972_v12 }
 0x203   : > { %v2819_v44 = vmul.f32 0.2, %v4193_v31  ;;  %v4197_v37 = vadd.f32 %v4196_v28, %v5957_v56  ;;  %3408 = vmatprep.mubr.bf16.mxu0 %v2919_v30 }
 0x204   : > { %v2822_v53 = vmul.f32 0.2, %v4195_v36  ;;  %3409 = vmatmul.mubr.bf16.gmra.mrb[52].mxu0 %v2918_v27  ;;  %v2882_v19 = vmax.f32 %v4191_v51, %v2818_v35 }
 0x205   : > { %v2823_v38 = vmul.f32 0.2, %v4197_v37  ;;  %v2196_v45 = vpop.f32.mrb[28].mxu0  ;;  %3460 = vmatpush1.bf16.msra.mxu0 %v4970_v34  ;;  %v2883_v55 = vmax.f32 %v4193_v31, %v2819_v44  ;;  %v4985_v31 = vld [vmem:[#allocation3 + $0x1f0] ss:$8 sps:$4 sm:$0xff]  }
 0x206   : > { %v2886_v33 = vmax.f32 %v4195_v36, %v2822_v53  ;;  %v4198_v43 = vadd.f32 %v2196_v45, %v6000_v25  ;;  %v2198_v52 = vpop.f32.mrb[29].mxu0  ;;  %3461 = vmatprep.subr.bf16.mxu0 %v4975_v32 }
 0x207   : > { %v2887_v46 = vmax.f32 %v4197_v37, %v2823_v38  ;;  %v4200_v21 = vadd.f32 %v2198_v52, %v6005_v1  ;;  %v2200_v62 = vpop.f32.mrb[30].mxu0 }
 0x208   : > { %v4199_v56 = vadd.f32 %v4198_v43, %v5962_v58  ;;  %v4202_v63 = vadd.f32 %v2200_v62, %v6000_v25  ;;  %v2202_v47 = vpop.f32.mrb[31].mxu0  ;;  %v2922_v0 = vpack.c.bf16 %v2886_v33, %v2882_v19  ;;  %v575_v25 = vsub.s32 3, %v5987_v17 }
 0x209   : > { %v4201_v2 = vadd.f32 %v4200_v21, %v5964_v59  ;;  %v4204_v22 = vadd.f32 %v2202_v47, %v6005_v1  ;;  %v2923_v3 = vpack.c.bf16 %v2887_v46, %v2883_v55  ;;  %3462 = vmatpush1.bf16.msra.mxu0 %v4973_v54  ;;  %v4979_v1 = vld [vmem:[#allocation3 + $0x1d0] ss:$8 sps:$4 sm:$0xff]  }
 0x20a   : > { %v2826_v23 = vmul.f32 0.2, %v4199_v56  ;;  %v4203_v39 = vadd.f32 %v4202_v63, %v5966_v60  ;;  %3463 = vmatprep.subr.bf16.mxu0 %v4978_v57  ;;  %v4984_v60 = vld [vmem:[#allocation3 + $0x1e4] ss:$8 sps:$4 sm:$0xff]   ;;  %v6077_v10 = vrot.slane %v5995_v20, %v575_v25 }
 0x20b   : > { %v2827_v40 = vmul.f32 0.2, %v4201_v2  ;;  %v4205_v58 = vadd.f32 %v4204_v22, %v5968_v61  ;;  %3418 = vmatprep.mubr.bf16.mxu0 %v2923_v3 }
 0x20c   : > { %v2830_v6 = vmul.f32 0.2, %v4203_v39  ;;  %3419 = vmatmul.mubr.bf16.gmra.mrb[56].mxu0 %v2922_v0  ;;  %v2890_v7 = vmax.f32 %v4199_v56, %v2826_v23 }
 0x20d   : > { %v2831_v59 = vmul.f32 0.2, %v4205_v58  ;;  %3464 = vmatpush1.bf16.msra.mxu0 %v4976_v4  ;;  %v2891_v11 = vmax.f32 %v4201_v2, %v2827_v40 }
 0x20e   : > { %v2894_v48 = vmax.f32 %v4203_v39, %v2830_v6  ;;  %3465 = vmatprep.subr.bf16.mxu0 %v4981_v9 }
 0x20f   : > { %v2895_v49 = vmax.f32 %v4205_v58, %v2831_v59 }
 0x210   : > { %v2926_v61 = vpack.c.bf16 %v2894_v48, %v2890_v7 }
 0x211   : > { %v2927_v14 = vpack.c.bf16 %v2895_v49, %v2891_v11  ;;  %3466 = vmatpush1.bf16.msra.mxu0 %v4979_v1 }
 0x212   : > { %3467 = vmatprep.subr.bf16.mxu0 %v4984_v60 }
 0x213   : > { %v2691_v41 = vpop.f32.mrb[32].mxu1  ;;  %3428 = vmatprep.mubr.bf16.mxu0 %v2927_v14 }
 0x214   : > { %v4206_v12 = vadd.f32 %v2691_v41, %v6074_v8  ;;  %v2693_v50 = vpop.f32.mrb[33].mxu1  ;;  %3429 = vmatmul.mubr.bf16.gmra.mrb[60].mxu0 %v2926_v61 }
 0x215   : > { %v4207_v16 = vadd.f32 %v2693_v50, %v6077_v10  ;;  %v2695_v13 = vpop.f32.mrb[34].mxu1  ;;  %3468 = vmatpush1.bf16.msra.mxu0 %v4982_v15 }
 0x216   : > { %v2772_v51 = vmul.f32 0.2, %v4206_v12  ;;  %v4208_v29 = vadd.f32 %v2695_v13, %v6074_v8  ;;  %v2697_v26 = vpop.f32.mrb[35].mxu1  ;;  %3469 = vmatprep.subr.bf16.mxu0 %v4987_v42 }
 0x217   : > { %v2773_v20 = vmul.f32 0.2, %v4207_v16  ;;  %v4209_v27 = vadd.f32 %v2697_v26, %v6077_v10 }
 0x218   : > { %v2776_v28 = vmul.f32 0.2, %v4208_v29  ;;  %v2836_v34 = vmax.f32 %v4206_v12, %v2772_v51 }
 0x219   : > { %v2777_v30 = vmul.f32 0.2, %v4209_v27  ;;  %v2837_v36 = vmax.f32 %v4207_v16, %v2773_v20  ;;  %3470 = vmatpush1.bf16.msra.mxu0 %v4985_v31 }
 0x21a   : > { %v2840_v35 = vmax.f32 %v4208_v29, %v2776_v28 }
 0x21b   : > { %v2841_v32 = vmax.f32 %v4209_v27, %v2777_v30  ;;  %v2701_v44 = vpop.f32.mrb[36].mxu1 }
 0x21c   : > { %v2900_v37 = vpack.c.bf16 %v2840_v35, %v2836_v34  ;;  %v4210_v53 = vadd.f32 %v2701_v44, %v6074_v8  ;;  %v2703_v38 = vpop.f32.mrb[37].mxu1 }
 0x21d   : > { %v4211_v45 = vadd.f32 %v2703_v38, %v6077_v10  ;;  %v2705_v54 = vpop.f32.mrb[38].mxu1  ;;  %v2901_v19 = vpack.c.bf16 %v2841_v32, %v2837_v36 }
 0x21e   : > { %v2780_v33 = vmul.f32 0.2, %v4210_v53  ;;  %v4212_v43 = vadd.f32 %v2705_v54, %v6074_v8  ;;  %v2707_v52 = vpop.f32.mrb[39].mxu1 }
 0x21f   : > { %v2781_v57 = vmul.f32 0.2, %v4211_v45  ;;  %v4213_v55 = vadd.f32 %v2707_v52, %v6077_v10  ;;  %3471 = vmatprep.mubr.bf16.mxu0 %v2901_v19 }
 0x220   : > { %v2784_v46 = vmul.f32 0.2, %v4212_v43  ;;  %3472 = vmatmul.mubr.bf16.vlgmr.msra.gmra.mrb[32].mxu0 %v2900_v37  ;;  %v2844_v62 = vmax.f32 %v4210_v53, %v2780_v33 }
 0x221   : > { %v2785_v21 = vmul.f32 0.2, %v4213_v55  ;;  %v2845_v63 = vmax.f32 %v4211_v45, %v2781_v57 }
 0x222   : > { %v2848_v56 = vmax.f32 %v4212_v43, %v2784_v46 }
 0x223   : > { %v2849_v47 = vmax.f32 %v4213_v55, %v2785_v21  ;;  %v2711_v0 = vpop.f32.mrb[40].mxu1 }
 0x224   : > { %v4214_v2 = vadd.f32 %v2711_v0, %v6074_v8  ;;  %v2713_v22 = vpop.f32.mrb[41].mxu1  ;;  %v2904_v3 = vpack.c.bf16 %v2848_v56, %v2844_v62 }
 0x225   : > { %v4215_v4 = vadd.f32 %v2713_v22, %v6077_v10  ;;  %v2715_v23 = vpop.f32.mrb[42].mxu1  ;;  %v2905_v39 = vpack.c.bf16 %v2849_v47, %v2845_v63 }
 0x226   : > { %v2788_v5 = vmul.f32 0.2, %v4214_v2  ;;  %v4216_v9 = vadd.f32 %v2715_v23, %v6074_v8  ;;  %v2717_v40 = vpop.f32.mrb[43].mxu1 }
 0x227   : > { %v2789_v58 = vmul.f32 0.2, %v4215_v4  ;;  %v4217_v25 = vadd.f32 %v2717_v40, %v6077_v10  ;;  %3481 = vmatprep.mubr.bf16.mxu0 %v2905_v39 }
 0x228   : > { %v2792_v6 = vmul.f32 0.2, %v4216_v9  ;;  %3482 = vmatmul.mubr.bf16.gmra.mrb[36].mxu0 %v2904_v3  ;;  %v2852_v1 = vmax.f32 %v4214_v2, %v2788_v5 }
 0x229   : > { %v2793_v59 = vmul.f32 0.2, %v4217_v25  ;;  %v2853_v48 = vmax.f32 %v4215_v4, %v2789_v58 }
 0x22a   : > { %v2856_v7 = vmax.f32 %v4216_v9, %v2792_v6 }
 0x22b   : > { %v2857_v60 = vmax.f32 %v4217_v25, %v2793_v59  ;;  %v2721_v11 = vpop.f32.mrb[44].mxu1 }
 0x22c   : > { %v4218_v49 = vadd.f32 %v2721_v11, %v6074_v8  ;;  %v2723_v61 = vpop.f32.mrb[45].mxu1  ;;  %v2908_v41 = vpack.c.bf16 %v2856_v7, %v2852_v1 }
 0x22d   : > { %v4219_v14 = vadd.f32 %v2723_v61, %v6077_v10  ;;  %v2725_v15 = vpop.f32.mrb[46].mxu1  ;;  %v2909_v12 = vpack.c.bf16 %v2857_v60, %v2853_v48 }
 0x22e   : > { %v2796_v50 = vmul.f32 0.2, %v4218_v49  ;;  %v4220_v42 = vadd.f32 %v2725_v15, %v6074_v8  ;;  %v2727_v16 = vpop.f32.mrb[47].mxu1 }
 0x22f   : > { %v2797_v13 = vmul.f32 0.2, %v4219_v14  ;;  %v4221_v51 = vadd.f32 %v2727_v16, %v6077_v10  ;;  %3491 = vmatprep.mubr.bf16.mxu0 %v2909_v12 }
 0x230   : > { %v2800_v29 = vmul.f32 0.2, %v4220_v42  ;;  %3492 = vmatmul.mubr.bf16.gmra.mrb[40].mxu0 %v2908_v41  ;;  %v2860_v20 = vmax.f32 %v4218_v49, %v2796_v50 }
 0x231   : > { %v2801_v26 = vmul.f32 0.2, %v4221_v51  ;;  %v2861_v31 = vmax.f32 %v4219_v14, %v2797_v13 }
 0x232   : > { %v2864_v27 = vmax.f32 %v4220_v42, %v2800_v29 }
 0x233   : > { %v2865_v28 = vmax.f32 %v4221_v51, %v2801_v26  ;;  %v2731_v30 = vpop.f32.mrb[48].mxu1 }
 0x234   : > { %v4222_v34 = vadd.f32 %v2731_v30, %v6074_v8  ;;  %v2733_v35 = vpop.f32.mrb[49].mxu1  ;;  %v2912_v36 = vpack.c.bf16 %v2864_v27, %v2860_v20 }
 0x235   : > { %v4223_v32 = vadd.f32 %v2733_v35, %v6077_v10  ;;  %v2735_v44 = vpop.f32.mrb[50].mxu1  ;;  %v2913_v37 = vpack.c.bf16 %v2865_v28, %v2861_v31 }
 0x236   : > { %v2804_v53 = vmul.f32 0.2, %v4222_v34  ;;  %v4224_v38 = vadd.f32 %v2735_v44, %v6074_v8  ;;  %v2737_v45 = vpop.f32.mrb[51].mxu1 }
 0x237   : > { %v2805_v54 = vmul.f32 0.2, %v4223_v32  ;;  %v4225_v19 = vadd.f32 %v2737_v45, %v6077_v10  ;;  %3501 = vmatprep.mubr.bf16.mxu0 %v2913_v37 }
 0x238   : > { %v2808_v33 = vmul.f32 0.2, %v4224_v38  ;;  %3502 = vmatmul.mubr.bf16.gmra.mrb[44].mxu0 %v2912_v36  ;;  %v2868_v52 = vmax.f32 %v4222_v34, %v2804_v53 }
 0x239   : > { %v2809_v43 = vmul.f32 0.2, %v4225_v19  ;;  %v2869_v55 = vmax.f32 %v4223_v32, %v2805_v54 }
 0x23a   : > { %v2872_v57 = vmax.f32 %v4224_v38, %v2808_v33 }
 0x23b   : > { %v2873_v46 = vmax.f32 %v4225_v19, %v2809_v43  ;;  %v2741_v21 = vpop.f32.mrb[52].mxu1 }
 0x23c   : > { %v4226_v62 = vadd.f32 %v2741_v21, %v6074_v8  ;;  %v2743_v56 = vpop.f32.mrb[53].mxu1  ;;  %v2916_v63 = vpack.c.bf16 %v2872_v57, %v2868_v52  ;;  %v5100_v57 = vmov 1966171168  }
 0x23d   : > { %v4227_v47 = vadd.f32 %v2743_v56, %v6077_v10  ;;  %v2745_v0 = vpop.f32.mrb[54].mxu1  ;;  %v2917_v2 = vpack.c.bf16 %v2873_v46, %v2869_v55  ;;  %v3653_v55 = vunpack.c.l.s4 %v5100_v57 }
 0x23e   : > { %v2812_v22 = vmul.f32 0.2, %v4226_v62  ;;  %v4228_v3 = vadd.f32 %v2745_v0, %v6074_v8  ;;  %v2747_v4 = vpop.f32.mrb[55].mxu1 }
 0x23f   : > { %v2813_v23 = vmul.f32 0.2, %v4227_v47  ;;  %v4229_v39 = vadd.f32 %v2747_v4, %v6077_v10  ;;  %3511 = vmatprep.mubr.bf16.mxu0 %v2917_v2 }
 0x240   : > { %v2816_v5 = vmul.f32 0.2, %v4228_v3  ;;  %3512 = vmatmul.mubr.bf16.gmra.mrb[48].mxu0 %v2916_v63  ;;  %v2876_v40 = vmax.f32 %v4226_v62, %v2812_v22  ;;  %v3633_v63 = vld [vmem:[#allocation2] sm:$0x1] }
 0x241   : > { %v2817_v9 = vmul.f32 0.2, %v4229_v39  ;;  %v2877_v25 = vmax.f32 %v4227_v47, %v2813_v23  ;;  %3636 = vperm.xlu0 %4517, %v3633_v63   ;;  %v2994_v47 = vld [vmem:[%s6221_s4] sm:$0x3] }
 0x242   : > { %v2880_v58 = vmax.f32 %v4228_v3, %v2816_v5  ;;  %v6128_v0 = vrot.slane %v2994_v47, %v5990_v18  ;;  %v6132_v2 = vrot.slane %v2994_v47, %v567_v24 }
 0x243   : > { %v2881_v6 = vmax.f32 %v4229_v39, %v2817_v9  ;;  %v2751_v59 = vpop.f32.mrb[56].mxu1 }
 0x244   : > { %v4230_v1 = vadd.f32 %v2751_v59, %v6074_v8  ;;  %v2753_v7 = vpop.f32.mrb[57].mxu1  ;;  %v2920_v48 = vpack.c.bf16 %v2880_v58, %v2876_v40 }
 0x245   : > { %v4231_v60 = vadd.f32 %v2753_v7, %v6077_v10  ;;  %v2755_v11 = vpop.f32.mrb[58].mxu1  ;;  %v2921_v49 = vpack.c.bf16 %v2881_v6, %v2877_v25 }
 0x246   : > { %v2820_v61 = vmul.f32 0.2, %v4230_v1  ;;  %v4232_v41 = vadd.f32 %v2755_v11, %v6074_v8  ;;  %v2757_v14 = vpop.f32.mrb[59].mxu1 }
 0x247   : > { %v2821_v15 = vmul.f32 0.2, %v4231_v60  ;;  %v4233_v12 = vadd.f32 %v2757_v14, %v6077_v10  ;;  %3521 = vmatprep.mubr.bf16.mxu0 %v2921_v49 }
 0x248   : > { %v2824_v50 = vmul.f32 0.2, %v4232_v41  ;;  %3522 = vmatmul.mubr.bf16.gmra.mrb[52].mxu0 %v2920_v48  ;;  %v2884_v16 = vmax.f32 %v4230_v1, %v2820_v61 }
 0x249   : > { %v2825_v42 = vmul.f32 0.2, %v4233_v12  ;;  %v2885_v51 = vmax.f32 %v4231_v60, %v2821_v15 }
 0x24a   : > { %v2888_v13 = vmax.f32 %v4232_v41, %v2824_v50 }
 0x24b   : > { %v2889_v29 = vmax.f32 %v4233_v12, %v2825_v42  ;;  %v2761_v26 = vpop.f32.mrb[60].mxu1 }
 0x24c   : > { %v4234_v20 = vadd.f32 %v2761_v26, %v6074_v8  ;;  %v2763_v27 = vpop.f32.mrb[61].mxu1  ;;  %v2924_v31 = vpack.c.bf16 %v2888_v13, %v2884_v16 }
 0x24d   : > { %v4235_v28 = vadd.f32 %v2763_v27, %v6077_v10  ;;  %v2765_v30 = vpop.f32.mrb[62].mxu1  ;;  %v2925_v34 = vpack.c.bf16 %v2889_v29, %v2885_v51 }
 0x24e   : > { %v2828_v35 = vmul.f32 0.2, %v4234_v20  ;;  %v4236_v36 = vadd.f32 %v2765_v30, %v6074_v8  ;;  %v2767_v32 = vpop.f32.mrb[63].mxu1 }
 0x24f   : > { %v2829_v44 = vmul.f32 0.2, %v4235_v28  ;;  %v4237_v37 = vadd.f32 %v2767_v32, %v6077_v10  ;;  %3531 = vmatprep.mubr.bf16.mxu0 %v2925_v34  ;;  %v6114_v8 = vld.sshfl [vmem:[%s6222_s5] sm:$0x11 pattern:$0x75316420]  ;;  %v3654_v10 = vunpack.c.0.s8 %v3653_v55 }
 0x250   : > { %v2832_v53 = vmul.f32 0.2, %v4236_v36  ;;  %3532 = vmatmul.mubr.bf16.gmra.mrb[56].mxu0 %v2924_v31  ;;  %v2892_v45 = vmax.f32 %v4234_v20, %v2828_v35  ;;  %v3651_v46 = vcombine.high %v6114_v8, %v6114_v8 }
 0x251   : > { %v2833_v38 = vmul.f32 0.2, %v4237_v37  ;;  %v2893_v19 = vmax.f32 %v4235_v28, %v2829_v44  ;;  %v6119_v21 = vsub.s32 %v3654_v10, %v5987_v17 }
 0x252   : > { %v2896_v54 = vmax.f32 %v4236_v36, %v2832_v53 }
 0x253   : > { %v2897_v33 = vmax.f32 %v4237_v37, %v2833_v38  ;;  %v3658_v62 = vrot.slane %v6114_v8, %v6119_v21  ;;  %v3665_v56 = vrot.slane %v3651_v46, %v6119_v21 }
 0x254   : > { %v2928_v43 = vpack.c.bf16 %v2896_v54, %v2892_v45 }
 0x255   : > { %v2929_v52 = vpack.c.bf16 %v2897_v33, %v2893_v19  ;;  %3700 = vmatprep.mubr.bf16.mxu1 %v3665_v56 }
 0x257   : > { %3541 = vmatprep.mubr.bf16.mxu0 %v2929_v52 }
 0x258   : > { %3542 = vmatmul.mubr.bf16.gmra.mrb[60].mxu0 %v2928_v43 }
 0x2f3   : > { %v3473_v22 = vpop.f32.mrb[32].mxu0 }
 0x2f4   : > { %v4238_v3 = vadd.f32 %v3473_v22, %v6128_v0  ;;  %v3475_v4 = vpop.f32.mrb[33].mxu0 }
 0x2f5   : > { %v4239_v23 = vadd.f32 %v3475_v4, %v6132_v2  ;;  %v3477_v39 = vpop.f32.mrb[34].mxu0 }
 0x2f6   : > { %v3552_v5 = vmul.f32 0.2, %v4238_v3  ;;  %v4240_v9 = vadd.f32 %v3477_v39, %v6128_v0  ;;  %v3479_v40 = vpop.f32.mrb[35].mxu0 }
 0x2f7   : > { %v3553_v58 = vmul.f32 0.2, %v4239_v23  ;;  %v4241_v25 = vadd.f32 %v3479_v40, %v6132_v2 }
 0x2f8   : > { %v3554_v6 = vmul.f32 0.2, %v4240_v9  ;;  %v3584_v1 = vmax.f32 %v4238_v3, %v3552_v5 }
 0x2f9   : > { %v3555_v59 = vmul.f32 0.2, %v4241_v25  ;;  %v3585_v24 = vmax.f32 %v4239_v23, %v3553_v58 }
 0x2fa   : > { %v3586_v17 = vmax.f32 %v4240_v9, %v3554_v6 }
 0x2fb   : > { %v3587_v7 = vmax.f32 %v4241_v25, %v3555_v59  ;;  %v3483_v48 = vpop.f32.mrb[36].mxu0 }
 0x2fc   : > { %v3617_v60 = vpack.c.bf16 %v3586_v17, %v3584_v1  ;;  %v4242_v11 = vadd.f32 %v3483_v48, %v6128_v0  ;;  %v3485_v49 = vpop.f32.mrb[37].mxu0 }
 0x2fd   : > { %v4243_v61 = vadd.f32 %v3485_v49, %v6132_v2  ;;  %v3487_v41 = vpop.f32.mrb[38].mxu0  ;;  %v3618_v14 = vpack.c.bf16 %v3587_v7, %v3585_v24 }
 0x2fe   : > { %v3556_v15 = vmul.f32 0.2, %v4242_v11  ;;  %v4244_v12 = vadd.f32 %v3487_v41, %v6128_v0  ;;  %v3489_v50 = vpop.f32.mrb[39].mxu0 }
 0x2ff   : > { %v3557_v42 = vmul.f32 0.2, %v4243_v61  ;;  %v4245_v16 = vadd.f32 %v3489_v50, %v6132_v2  ;;  %3668 = vmatprep.subr.bf16.mxu1 %v3618_v14 }
 0x300   : > { %v3558_v13 = vmul.f32 0.2, %v4244_v12  ;;  %3669 = vmatpush1.bf16.xpose.msra.mxu1 %v3617_v60  ;;  %v3588_v29 = vmax.f32 %v4242_v11, %v3556_v15 }
 0x301   : > { %v3559_v51 = vmul.f32 0.2, %v4245_v16  ;;  %v3589_v20 = vmax.f32 %v4243_v61, %v3557_v42 }
 0x302   : > { %v3590_v26 = vmax.f32 %v4244_v12, %v3558_v13 }
 0x303   : > { %v3591_v27 = vmax.f32 %v4245_v16, %v3559_v51  ;;  %v3493_v31 = vpop.f32.mrb[40].mxu0 }
 0x304   : > { %v3619_v28 = vpack.c.bf16 %v3590_v26, %v3588_v29  ;;  %v4246_v30 = vadd.f32 %v3493_v31, %v6128_v0  ;;  %v3495_v34 = vpop.f32.mrb[41].mxu0 }
 0x305   : > { %v4247_v35 = vadd.f32 %v3495_v34, %v6132_v2  ;;  %v3497_v36 = vpop.f32.mrb[42].mxu0  ;;  %v3620_v32 = vpack.c.bf16 %v3591_v27, %v3589_v20 }
 0x306   : > { %v3560_v44 = vmul.f32 0.2, %v4246_v30  ;;  %v4248_v37 = vadd.f32 %v3497_v36, %v6128_v0  ;;  %v3499_v53 = vpop.f32.mrb[43].mxu0 }
 0x307   : > { %v3561_v38 = vmul.f32 0.2, %v4247_v35  ;;  %v4249_v45 = vadd.f32 %v3499_v53, %v6132_v2  ;;  %3670 = vmatprep.subr.bf16.mxu1 %v3620_v32 }
 0x308   : > { %v3562_v54 = vmul.f32 0.2, %v4248_v37  ;;  %3671 = vmatpush1.bf16.xpose.msra.mxu1 %v3619_v28  ;;  %v3592_v33 = vmax.f32 %v4246_v30, %v3560_v44 }
 0x309   : > { %v3563_v19 = vmul.f32 0.2, %v4249_v45  ;;  %v3593_v52 = vmax.f32 %v4247_v35, %v3561_v38 }
 0x30a   : > { %v3594_v43 = vmax.f32 %v4248_v37, %v3562_v54 }
 0x30b   : > { %v3595_v57 = vmax.f32 %v4249_v45, %v3563_v19  ;;  %v3503_v55 = vpop.f32.mrb[44].mxu0 }
 0x30c   : > { %v3621_v10 = vpack.c.bf16 %v3594_v43, %v3592_v33  ;;  %v4250_v46 = vadd.f32 %v3503_v55, %v6128_v0  ;;  %v3505_v56 = vpop.f32.mrb[45].mxu0 }
 0x30d   : > { %v4251_v63 = vadd.f32 %v3505_v56, %v6132_v2  ;;  %v3507_v47 = vpop.f32.mrb[46].mxu0  ;;  %v3622_v22 = vpack.c.bf16 %v3595_v57, %v3593_v52 }
 0x30e   : > { %v3564_v3 = vmul.f32 0.2, %v4250_v46  ;;  %v4252_v4 = vadd.f32 %v3507_v47, %v6128_v0  ;;  %v3509_v23 = vpop.f32.mrb[47].mxu0 }
 0x30f   : > { %v3565_v39 = vmul.f32 0.2, %v4251_v63  ;;  %v4253_v5 = vadd.f32 %v3509_v23, %v6132_v2  ;;  %3672 = vmatprep.subr.bf16.mxu1 %v3622_v22 }
 0x310   : > { %v3566_v9 = vmul.f32 0.2, %v4252_v4  ;;  %3673 = vmatpush1.bf16.xpose.msra.mxu1 %v3621_v10  ;;  %v3596_v58 = vmax.f32 %v4250_v46, %v3564_v3 }
 0x311   : > { %v3567_v40 = vmul.f32 0.2, %v4253_v5  ;;  %v3597_v6 = vmax.f32 %v4251_v63, %v3565_v39 }
 0x312   : > { %v3598_v25 = vmax.f32 %v4252_v4, %v3566_v9 }
 0x313   : > { %v3599_v59 = vmax.f32 %v4253_v5, %v3567_v40  ;;  %v3513_v1 = vpop.f32.mrb[48].mxu0 }
 0x314   : > { %v3623_v17 = vpack.c.bf16 %v3598_v25, %v3596_v58  ;;  %v4254_v24 = vadd.f32 %v3513_v1, %v6128_v0  ;;  %v3515_v7 = vpop.f32.mrb[49].mxu0 }
 0x315   : > { %v4255_v48 = vadd.f32 %v3515_v7, %v6132_v2  ;;  %v3517_v60 = vpop.f32.mrb[50].mxu0  ;;  %v3624_v11 = vpack.c.bf16 %v3599_v59, %v3597_v6 }
 0x316   : > { %v3568_v49 = vmul.f32 0.2, %v4254_v24  ;;  %v4256_v61 = vadd.f32 %v3517_v60, %v6128_v0  ;;  %v3519_v41 = vpop.f32.mrb[51].mxu0 }
 0x317   : > { %v3569_v14 = vmul.f32 0.2, %v4255_v48  ;;  %v4257_v15 = vadd.f32 %v3519_v41, %v6132_v2  ;;  %3674 = vmatprep.subr.bf16.mxu1 %v3624_v11 }
 0x318   : > { %v3570_v12 = vmul.f32 0.2, %v4256_v61  ;;  %3675 = vmatpush1.bf16.xpose.msra.mxu1 %v3623_v17  ;;  %v3600_v42 = vmax.f32 %v4254_v24, %v3568_v49 }
 0x319   : > { %v3571_v50 = vmul.f32 0.2, %v4257_v15  ;;  %v3601_v13 = vmax.f32 %v4255_v48, %v3569_v14 }
 0x31a   : > { %v3602_v16 = vmax.f32 %v4256_v61, %v3570_v12 }
 0x31b   : > { %v3603_v51 = vmax.f32 %v4257_v15, %v3571_v50  ;;  %v3523_v29 = vpop.f32.mrb[52].mxu0 }
 0x31c   : > { %v3625_v26 = vpack.c.bf16 %v3602_v16, %v3600_v42  ;;  %v4258_v20 = vadd.f32 %v3523_v29, %v6128_v0  ;;  %v3525_v27 = vpop.f32.mrb[53].mxu0 }
 0x31d   : > { %v4259_v31 = vadd.f32 %v3525_v27, %v6132_v2  ;;  %v3527_v28 = vpop.f32.mrb[54].mxu0  ;;  %v3626_v30 = vpack.c.bf16 %v3603_v51, %v3601_v13 }
 0x31e   : > { %v3572_v34 = vmul.f32 0.2, %v4258_v20  ;;  %v4260_v35 = vadd.f32 %v3527_v28, %v6128_v0  ;;  %v3529_v36 = vpop.f32.mrb[55].mxu0 }
 0x31f   : > { %v3573_v32 = vmul.f32 0.2, %v4259_v31  ;;  %v4261_v44 = vadd.f32 %v3529_v36, %v6132_v2  ;;  %3676 = vmatprep.subr.bf16.mxu1 %v3626_v30 }
 0x320   : > { %v3574_v37 = vmul.f32 0.2, %v4260_v35  ;;  %3677 = vmatpush1.bf16.xpose.msra.mxu1 %v3625_v26  ;;  %v3604_v38 = vmax.f32 %v4258_v20, %v3572_v34 }
 0x321   : > { %v3575_v53 = vmul.f32 0.2, %v4261_v44  ;;  %v3605_v54 = vmax.f32 %v4259_v31, %v3573_v32 }
 0x322   : > { %v3606_v45 = vmax.f32 %v4260_v35, %v3574_v37 }
 0x323   : > { %v3607_v19 = vmax.f32 %v4261_v44, %v3575_v53  ;;  %v3533_v33 = vpop.f32.mrb[56].mxu0 }
 0x324   : > { %v3627_v43 = vpack.c.bf16 %v3606_v45, %v3604_v38  ;;  %v4262_v52 = vadd.f32 %v3533_v33, %v6128_v0  ;;  %v3535_v57 = vpop.f32.mrb[57].mxu0 }
 0x325   : > { %v4263_v55 = vadd.f32 %v3535_v57, %v6132_v2  ;;  %v3537_v10 = vpop.f32.mrb[58].mxu0  ;;  %v3628_v46 = vpack.c.bf16 %v3607_v19, %v3605_v54 }
 0x326   : > { %v3576_v56 = vmul.f32 0.2, %v4262_v52  ;;  %v4264_v63 = vadd.f32 %v3537_v10, %v6128_v0  ;;  %v3539_v47 = vpop.f32.mrb[59].mxu0 }
 0x327   : > { %v3577_v22 = vmul.f32 0.2, %v4263_v55  ;;  %v4265_v3 = vadd.f32 %v3539_v47, %v6132_v2  ;;  %3678 = vmatprep.subr.bf16.mxu1 %v3628_v46 }
 0x328   : > { %v3578_v4 = vmul.f32 0.2, %v4264_v63  ;;  %3679 = vmatpush1.bf16.xpose.msra.mxu1 %v3627_v43  ;;  %v3608_v39 = vmax.f32 %v4262_v52, %v3576_v56 }
 0x329   : > { %v3579_v23 = vmul.f32 0.2, %v4265_v3  ;;  %v3609_v9 = vmax.f32 %v4263_v55, %v3577_v22 }
 0x32a   : > { %v3610_v5 = vmax.f32 %v4264_v63, %v3578_v4 }
 0x32b   : > { %v3611_v40 = vmax.f32 %v4265_v3, %v3579_v23  ;;  %v3543_v58 = vpop.f32.mrb[60].mxu0 }
 0x32c   : > { %v3629_v25 = vpack.c.bf16 %v3610_v5, %v3608_v39  ;;  %v4266_v6 = vadd.f32 %v3543_v58, %v6128_v0  ;;  %v3545_v59 = vpop.f32.mrb[61].mxu0 }
 0x32d   : > { %v4267_v1 = vadd.f32 %v3545_v59, %v6132_v2  ;;  %v3547_v17 = vpop.f32.mrb[62].mxu0  ;;  %v3630_v24 = vpack.c.bf16 %v3611_v40, %v3609_v9 }
 0x32e   : > { %v3580_v7 = vmul.f32 0.2, %v4266_v6  ;;  %v4268_v48 = vadd.f32 %v3547_v17, %v6128_v0  ;;  %v3549_v60 = vpop.f32.mrb[63].mxu0  ;;  %v3637_v0 = vpop.permute.xlu0 %3636 }
 0x32f   : > { %v3581_v11 = vmul.f32 0.2, %v4267_v1  ;;  %v4269_v49 = vadd.f32 %v3549_v60, %v6132_v2  ;;  %3680 = vmatprep.subr.bf16.mxu1 %v3630_v24  ;;  %v3642_v2 = vrot.slane %v3637_v0, %v5990_v18 }
 0x330   : > { %v3582_v61 = vmul.f32 0.2, %v4268_v48  ;;  %3681 = vmatpush1.bf16.xpose.msra.mxu1 %v3629_v25  ;;  %v3612_v14 = vmax.f32 %v4266_v6, %v3580_v7 }
 0x331   : > { %v3583_v41 = vmul.f32 0.2, %v4269_v49  ;;  %v3613_v12 = vmax.f32 %v4267_v1, %v3581_v11 }
 0x332   : > { %v3614_v15 = vmax.f32 %v4268_v48, %v3582_v61 }
 0x333   : > { %v3615_v50 = vmax.f32 %v4269_v49, %v3583_v41 }
 0x334   : > { %v3631_v42 = vpack.c.bf16 %v3614_v15, %v3612_v14 }
 0x335   : > { %v3632_v16 = vpack.c.bf16 %v3615_v50, %v3613_v12 }
 0x337   : > { %3682 = vmatprep.subr.bf16.mxu1 %v3632_v16 }
 0x338   : > { %3683 = vmatpush1.bf16.xpose.msra.mxu1 %v3631_v42 }
 0x33f   : > { %3701 = vmatmul.mubr.bf16.vlgmr.msra.gmra.mrb[64].mxu1 %v3658_v62 }
 0x412   : > { %v3702_v13 = vpop.f32.mrb[64].mxu1 }
 0x413   : > { %v3703_v51 = vadd.f32 %v3702_v13, %v3642_v2  ;;  %v3704_v29 = vpop.f32.mrb[65].mxu1 }
 0x414   : > { %v3705_v26 = vpop.f32.mrb[66].mxu1 }
 0x415   : > { %v3708_v20 = vand.u32 2147483647, %v3703_v51  ;;  %v3706_v27 = vpop.f32.mrb[67].mxu1  ;;  %vm3714_vm1 = vcmp.ge.f32.partialorder %v3703_v51, 0.0 }
 0x417   : > { %v3709_v31 = vsub.f32 0.0, %v3708_v20 }
 0x419   : > { %v3710_v28 = vmul.f32 1.442695, %v3709_v31 }
 0x41b   : > { %4988 = vpow2.f32 %v3710_v28 }
 0x425   : > { %v4989_v30 = vpop.eup %4988 }
 0x426   : > { %v3712_v34 = vadd.f32 1.0, %v4989_v30 }
 0x428   : > { %4990 = vrcp.f32 %v3712_v34 }
 0x432   : > { %v4991_v8 = vpop.eup %4990 }
 0x433   : > { %v3715_v21 = vsub.f32 1.0, %v4991_v8 }
 0x435   : > { %v3716_v18 = vsel %vm3714_vm1, %v4991_v8, %v3715_v21 }
 0x436   : > { %3717 = vst [vmem:[%s290_s30] sm:$0x1] %v3716_v18 }
 0x437   : > { %5041 = shalt.err (!%p5038_p7)
}
 0x438   : > { %s5042_s18 = scalar_lea.hbm %s6175_s16, 16  ;;  %s5046_s22 = scalar_lea.hbm %s6224_s7, 32 }
 0x439   : > { %p5043_p8 = scmp.ne.s32.totalorder %s6175_s16, %s5042_s18  ;;  %p5047_p1 = scmp.lt.u32.totalorder %s6175_s16, %s6224_s7 }
 0x43a   : > { %p5048_p0 = scmp.lt.u32.totalorder %s5046_s22, %s5042_s18  ;;  %p5050_p6 = scmp.lt.u32.totalorder %s5042_s18, %s6175_s16 }
 0x43b   : > { %p5044_p11 = pnand %p5043_p8, %p6235_p9 }
 0x43c   : > { %p5049_p5 = por %p5048_p0, %p5047_p1 }
 0x43d   : > { %p5045_p13 = pneg %p5044_p11 }
 0x43e   : > { %p5051_p10 = por %p5050_p6, %p5049_p5 }
 0x440   : > { %p5052_p12 = pnand %p5051_p10, %p5045_p13 }
 0x442   : > { %5055 = shalt.err (!%p5052_p12)
}
 0x443   : > { %4467 = dma.vmem_to_hbm [thread:$0]  (%p6235_p9), %s6177_s9, 16, %s6175_s16, %s3719_s14  }
 0x444 PF: > { %p4479_p2 = scmp.ge.s32.totalorder %s5094_s29, 2  ;;  %s3743_s30 = sand.u32 1, %s5082_s26  }
 0x445   : > { %p6236_p3 = scmp.ne.s32.totalorder %s6229_s13, 0  ;;  %s3744_s10 = scalar_lea.sflag [#allocation5], %s3743_s30 }
 0x447   : > { %p4474_p4 = pnand %p4479_p2, %p6236_p3 }
 0x449   : > { %5077 = dma.done.wait (!%p4474_p4), %s3744_s10, 16  }
 0x44a   : > { %5079 = vsyncadd (!%p4474_p4), %s3744_s10, 4294967280  ;;  %p20_p7 = scmp.ge.s32.totalorder %s5170_s8, 4   ;;  %s6237_s26 = smov %s5086_s27 }
 0x44b   : > { %s6238_s27 = smov %s5090_s28  ;;  %s6239_s28 = smov %s5181_s11 }
 0x44c   : > { %s6240_s29 = smov %s5170_s8  ;;  %22 = sbr.rel (!%p20_p7) target bundleno = 7 (0x7), region = 88 }
 0x453   :  { %3748 = vsyncpa [#allocation4], 1 }
 0x454   :  { %3750 = vsyncpa [#allocation4 + $0x1], 1 }
 0x455   :  { %3751 = vsyncpa [#allocation5], 1 }
 0x456   :  { %3753 = vsyncpa [#allocation5 + $0x1], 1 }

</bundles_post_ra>
